<compile_context>
chip_gen: v5e
topology: v5e:2x2
jax: 0.10.0
libtpu: 0.0.40
codegen_flags: <defaults>
</compile_context>

<pallas_src>
import functools

import jax
import jax.numpy as jnp
from jax import lax
from jax.experimental import pallas as pl
from jax.experimental.pallas import tpu as pltpu


# ----------------------------- fused Pallas kernel -----------------------------

def decoder_forward_kernel(
    x_ref, emb_w_ref, emb_b_ref, pe_ref,
    m1_wq_ref, m1_bq_ref, m1_wk_ref, m1_bk_ref, m1_wv_ref, m1_bv_ref,
    m2_wq_ref, m2_bq_ref, m2_wk_ref, m2_bk_ref, m2_wv_ref, m2_bv_ref,
    ff_w1_ref, ff_b1_ref, ff_w2_ref, ff_b2_ref,
    norm_g_ref, norm_b_ref, out_w_ref, out_b_ref,
    o_ref,
    *, nb_layers, nb_heads, dim_key, dim_value, dim_model):
    """Whole LonelyDecoder forward in one kernel. All weights are [in, out]."""
    inv_dim = 1.0 / float(dim_model)
    gamma = norm_g_ref[...]
    beta = norm_b_ref[...]

    def layer_norm(z):
        # LayerNorm(x + sublayer(x)), PyTorch semantics (biased var, eps=1e-5)
        mu = jnp.mean(z, axis=-1, keepdims=True)
        var = jnp.mean(jnp.square(z - mu), axis=-1, keepdims=True)
        return (z - mu) * lax.rsqrt(var + 1e-5) * gamma + beta

    def mha(xin, wq, bq, wk, bk, wv, bv, masked):
        # Fused-across-heads projections: one matmul each for Q, K, V.
        q = jnp.dot(xin, wq, preferred_element_type=jnp.float32) + bq  # [S, H*dk]
        k = jnp.dot(xin, wk, preferred_element_type=jnp.float32) + bk  # [S, H*dk]
        v = jnp.dot(xin, wv, preferred_element_type=jnp.float32) + bv  # [S, H*dv]
        seq = xin.shape[0]
        outs = []
        for h in range(nb_heads):
            qh = q[:, h * dim_key:(h + 1) * dim_key]
            kh = k[:, h * dim_key:(h + 1) * dim_key]
            vh = v[:, h * dim_value:(h + 1) * dim_value]
            # scores: contract on dk without transposing k
            s = lax.dot_general(qh, kh, (((1,), (1,)), ((), ())),
                                preferred_element_type=jnp.float32) * inv_dim
            if masked:
                row = lax.broadcasted_iota(jnp.int32, (seq, seq), 0)
                col = lax.broadcasted_iota(jnp.int32, (seq, seq), 1)
                s = jnp.where(col > row, -jnp.inf, s)   # strictly-upper-tri masked
            p = jax.nn.softmax(s, axis=-1)
            outs.append(jnp.dot(p, vh, preferred_element_type=jnp.float32))
        # torch.cat(heads, dim=1)
        return jnp.concatenate(outs, axis=-1)

    # embedding + positional encoding
    x_emb = (jnp.dot(x_ref[...], emb_w_ref[...],
                     preferred_element_type=jnp.float32)
             + emb_b_ref[...] + pe_ref[...])

    layer_output = x_emb
    for l in range(nb_layers):   # NB: x_emb never updated across layers (bug kept)
        h1 = layer_norm(x_emb + mha(x_emb,
                                    m1_wq_ref[l], m1_bq_ref[l],
                                    m1_wk_ref[l], m1_bk_ref[l],
                                    m1_wv_ref[l], m1_bv_ref[l], True))
        h2 = layer_norm(h1 + mha(h1,
                                 m2_wq_ref[l], m2_bq_ref[l],
                                 m2_wk_ref[l], m2_bk_ref[l],
                                 m2_wv_ref[l], m2_bv_ref[l], False))
        hid = jnp.maximum(
            jnp.dot(h2, ff_w1_ref[l], preferred_element_type=jnp.float32)
            + ff_b1_ref[l], 0.0)
        ff = (jnp.dot(hid, ff_w2_ref[l], preferred_element_type=jnp.float32)
              + ff_b2_ref[l])
        layer_output = layer_norm(h2 + ff)

    logits = (jnp.dot(layer_output, out_w_ref[...],
                      preferred_element_type=jnp.float32) + out_b_ref[...])
    o_ref[...] = jax.nn.softmax(logits, axis=-1)


# ----------------------------- pallas_call glue -----------------------------

def _full_spec(shape):
    return pl.BlockSpec(shape, lambda i: (0,) * len(shape))


def positional_encoding(seq_len, dim_model):
    # TODO(synk): reference positionalEncoding() unavailable; standard sinusoidal PE.
    pos = jnp.arange(seq_len, dtype=jnp.float32)[:, None]
    i = jnp.arange(dim_model)[None, :]
    angle = pos / jnp.power(10000.0, (2 * (i // 2)).astype(jnp.float32) / dim_model)
    return jnp.where(i % 2 == 0, jnp.sin(angle), jnp.cos(angle)).astype(jnp.float32)


def lonely_decoder_forward(x, params):
    S = x.shape[0]
    D = params["dim_model"]
    V = params["vocab"]

    pe = positional_encoding(S, D)

    kernel = functools.partial(
        decoder_forward_kernel,
        nb_layers=params["nb_layers"], nb_heads=params["nb_heads"],
        dim_key=params["dim_key"], dim_value=params["dim_value"],
        dim_model=D)

    inputs = [
        x, params["emb_w"], params["emb_b"], pe,
        params["m1_wq"], params["m1_bq"], params["m1_wk"], params["m1_bk"],
        params["m1_wv"], params["m1_bv"],
        params["m2_wq"], params["m2_bq"], params["m2_wk"], params["m2_bk"],
        params["m2_wv"], params["m2_bv"],
        params["ff_w1"], params["ff_b1"], params["ff_w2"], params["ff_b2"],
        params["norm_g"], params["norm_b"],
        params["out_w"], params["out_b"],
    ]

    return pl.pallas_call(
        kernel,
        grid=(1,),
        in_specs=[_full_spec(a.shape) for a in inputs],
        out_specs=_full_spec((S, V)),
        out_shape=jax.ShapeDtypeStruct((S, V), jnp.float32),
        compiler_params=pltpu.CompilerParams(
            dimension_semantics=("arbitrary",)),
    )(*inputs)


# ----------------------------- parameter init -----------------------------

def _init_linear(key, out_dim, in_dim):
    kw, kb = jax.random.split(key)
    bound = 1.0 / float(in_dim) ** 0.5
    w = jax.random.uniform(kw, (out_dim, in_dim), jnp.float32, -bound, bound)
    b = jax.random.uniform(kb, (1, out_dim), jnp.float32, -bound, bound)
    return w, b


def init_params(key, model_parameters):
    dec = model_parameters["decoder"]
    V = model_parameters["vocabulary_size"]
    D = dec["dim_model"]
    F = dec["feedforward"]["dim_feedforward"]
    H = dec["multihead"]["nb_heads"]
    dk = dec["multihead"]["attention"]["dim_key"]
    dv = dec["multihead"]["attention"]["dim_value"]
    nl = dec["nb_layers"]

    keys = iter(jax.random.split(key, 4096))

    def lin_t(out_d, in_d):
        # nn.Linear init, weight pre-transposed to [in, out], bias [1, out]
        w, b = _init_linear(next(keys), out_d, in_d)
        return w.T, b

    def mha_fused():
        wq, bq, wk, bk, wv, bv = [], [], [], [], [], []
        for _ in range(H):
            w, b = lin_t(dk, D); wq.append(w); bq.append(b)
            w, b = lin_t(dk, D); wk.append(w); bk.append(b)
            w, b = lin_t(dv, D); wv.append(w); bv.append(b)
        return (jnp.concatenate(wq, 1), jnp.concatenate(bq, 1),
                jnp.concatenate(wk, 1), jnp.concatenate(bk, 1),
                jnp.concatenate(wv, 1), jnp.concatenate(bv, 1))

    emb_w, emb_b = lin_t(D, V)       # [V, D], [1, D]
    out_w, out_b = lin_t(V, D)       # [D, V], [1, V]

    m1 = [mha_fused() for _ in range(nl)]
    m2 = [mha_fused() for _ in range(nl)]
    ff = [(lin_t(F, D), lin_t(D, F)) for _ in range(nl)]

    def stack_mha(ms, prefix):
        names = ("wq", "bq", "wk", "bk", "wv", "bv")
        return {prefix + n: jnp.stack([m[i] for m in ms])
                for i, n in enumerate(names)}

    params = dict(
        vocab=V, dim_model=D, nb_layers=nl, nb_heads=H, dim_key=dk, dim_value=dv,
        emb_w=emb_w, emb_b=emb_b,
        norm_g=jnp.ones((1, D), jnp.float32),
        norm_b=jnp.zeros((1, D), jnp.float32),
        out_w=out_w, out_b=out_b,
        ff_w1=jnp.stack([f[0][0] for f in ff]),   # [L, D, F]
        ff_b1=jnp.stack([f[0][1] for f in ff]),   # [L, 1, F]
        ff_w2=jnp.stack([f[1][0] for f in ff]),   # [L, F, D]
        ff_b2=jnp.stack([f[1][1] for f in ff]),   # [L, 1, D]
    )
    params.update(stack_mha(m1, "m1_"))
    params.update(stack_mha(m2, "m2_"))
    return params


# ----------------------------- main -----------------------------

if __name__ == "__main__":
    model_parameters = {
        "vocabulary_size": 32,
        "dim_model": 32,
        "decoder": {
            "dim_model": 32,
            "nb_layers": 2,
            "feedforward": {"dim_feedforward": 64},
            "multihead": {"nb_heads": 2,
                          "attention": {"dim_key": 16, "dim_value": 16}},
        },
    }
    key = jax.random.PRNGKey(0)
    k_params, k_x = jax.random.split(key)
    params = init_params(k_params, model_parameters)

    seq_len = 8
    x = jax.random.normal(k_x, (seq_len, model_parameters["vocabulary_size"]),
                          jnp.float32)            # [seq, vocab]

    out = lonely_decoder_forward(x, params)       # [seq, vocab] probabilities
    jax.block_until_ready(out)
    assert out.shape == (seq_len, model_parameters["vocabulary_size"])
    print("KERNEL_OK")
</pallas_src>

<mosaic_0001>
module attributes {stable_mosaic.version = 11 : i64} {
  func.func @decoder_forward_kernel(%arg0: i32, %arg1: memref<8x32xf32, #tpu.memory_space<vmem>>, %arg2: memref<32x32xf32, #tpu.memory_space<vmem>>, %arg3: memref<1x32xf32, #tpu.memory_space<vmem>>, %arg4: memref<8x32xf32, #tpu.memory_space<vmem>>, %arg5: memref<2x32x32xf32, #tpu.memory_space<vmem>>, %arg6: memref<2x1x32xf32, #tpu.memory_space<vmem>>, %arg7: memref<2x32x32xf32, #tpu.memory_space<vmem>>, %arg8: memref<2x1x32xf32, #tpu.memory_space<vmem>>, %arg9: memref<2x32x32xf32, #tpu.memory_space<vmem>>, %arg10: memref<2x1x32xf32, #tpu.memory_space<vmem>>, %arg11: memref<2x32x32xf32, #tpu.memory_space<vmem>>, %arg12: memref<2x1x32xf32, #tpu.memory_space<vmem>>, %arg13: memref<2x32x32xf32, #tpu.memory_space<vmem>>, %arg14: memref<2x1x32xf32, #tpu.memory_space<vmem>>, %arg15: memref<2x32x32xf32, #tpu.memory_space<vmem>>, %arg16: memref<2x1x32xf32, #tpu.memory_space<vmem>>, %arg17: memref<2x32x64xf32, #tpu.memory_space<vmem>>, %arg18: memref<2x1x64xf32, #tpu.memory_space<vmem>>, %arg19: memref<2x64x32xf32, #tpu.memory_space<vmem>>, %arg20: memref<2x1x32xf32, #tpu.memory_space<vmem>>, %arg21: memref<1x32xf32, #tpu.memory_space<vmem>>, %arg22: memref<1x32xf32, #tpu.memory_space<vmem>>, %arg23: memref<32x32xf32, #tpu.memory_space<vmem>>, %arg24: memref<1x32xf32, #tpu.memory_space<vmem>>, %arg25: memref<8x32xf32, #tpu.memory_space<vmem>>) attributes {dimension_semantics = [#tpu.dimension_semantics<arbitrary>], iteration_bounds = array<i64: 1>, scalar_prefetch = 0 : i64, scratch_operands = 0 : i64, tpu.core_type = #tpu.core_type<tc>, window_params = [{pipeline_mode = #tpu.pipeline_mode<synchronous>, transform_indices = @transform_0, window_bounds = array<i64: 8, 32>}, {pipeline_mode = #tpu.pipeline_mode<synchronous>, transform_indices = @transform_1, window_bounds = array<i64: 32, 32>}, {pipeline_mode = #tpu.pipeline_mode<synchronous>, transform_indices = @transform_2, window_bounds = array<i64: 1, 32>}, {pipeline_mode = #tpu.pipeline_mode<synchronous>, transform_indices = @transform_3, window_bounds = array<i64: 8, 32>}, {pipeline_mode = #tpu.pipeline_mode<synchronous>, transform_indices = @transform_4, window_bounds = array<i64: 2, 32, 32>}, {pipeline_mode = #tpu.pipeline_mode<synchronous>, transform_indices = @transform_5, window_bounds = array<i64: 2, 1, 32>}, {pipeline_mode = #tpu.pipeline_mode<synchronous>, transform_indices = @transform_6, window_bounds = array<i64: 2, 32, 32>}, {pipeline_mode = #tpu.pipeline_mode<synchronous>, transform_indices = @transform_7, window_bounds = array<i64: 2, 1, 32>}, {pipeline_mode = #tpu.pipeline_mode<synchronous>, transform_indices = @transform_8, window_bounds = array<i64: 2, 32, 32>}, {pipeline_mode = #tpu.pipeline_mode<synchronous>, transform_indices = @transform_9, window_bounds = array<i64: 2, 1, 32>}, {pipeline_mode = #tpu.pipeline_mode<synchronous>, transform_indices = @transform_10, window_bounds = array<i64: 2, 32, 32>}, {pipeline_mode = #tpu.pipeline_mode<synchronous>, transform_indices = @transform_11, window_bounds = array<i64: 2, 1, 32>}, {pipeline_mode = #tpu.pipeline_mode<synchronous>, transform_indices = @transform_12, window_bounds = array<i64: 2, 32, 32>}, {pipeline_mode = #tpu.pipeline_mode<synchronous>, transform_indices = @transform_13, window_bounds = array<i64: 2, 1, 32>}, {pipeline_mode = #tpu.pipeline_mode<synchronous>, transform_indices = @transform_14, window_bounds = array<i64: 2, 32, 32>}, {pipeline_mode = #tpu.pipeline_mode<synchronous>, transform_indices = @transform_15, window_bounds = array<i64: 2, 1, 32>}, {pipeline_mode = #tpu.pipeline_mode<synchronous>, transform_indices = @transform_16, window_bounds = array<i64: 2, 32, 64>}, {pipeline_mode = #tpu.pipeline_mode<synchronous>, transform_indices = @transform_17, window_bounds = array<i64: 2, 1, 64>}, {pipeline_mode = #tpu.pipeline_mode<synchronous>, transform_indices = @transform_18, window_bounds = array<i64: 2, 64, 32>}, {pipeline_mode = #tpu.pipeline_mode<synchronous>, transform_indices = @transform_19, window_bounds = array<i64: 2, 1, 32>}, {pipeline_mode = #tpu.pipeline_mode<synchronous>, transform_indices = @transform_20, window_bounds = array<i64: 1, 32>}, {pipeline_mode = #tpu.pipeline_mode<synchronous>, transform_indices = @transform_21, window_bounds = array<i64: 1, 32>}, {pipeline_mode = #tpu.pipeline_mode<synchronous>, transform_indices = @transform_22, window_bounds = array<i64: 32, 32>}, {pipeline_mode = #tpu.pipeline_mode<synchronous>, transform_indices = @transform_23, window_bounds = array<i64: 1, 32>}, {pipeline_mode = #tpu.pipeline_mode<synchronous>, transform_indices = @transform_24, window_bounds = array<i64: 8, 32>}]} {
    %c0 = arith.constant 0 : index
    %c0_0 = arith.constant 0 : index
    %0 = vector.load %arg21[%c0, %c0_0] : memref<1x32xf32, #tpu.memory_space<vmem>>, vector<1x32xf32>
    %c0_1 = arith.constant 0 : index
    %c0_2 = arith.constant 0 : index
    %1 = vector.load %arg22[%c0_1, %c0_2] : memref<1x32xf32, #tpu.memory_space<vmem>>, vector<1x32xf32>
    %c0_3 = arith.constant 0 : index
    %c0_4 = arith.constant 0 : index
    %2 = vector.load %arg1[%c0_3, %c0_4] : memref<8x32xf32, #tpu.memory_space<vmem>>, vector<8x32xf32>
    %c0_5 = arith.constant 0 : index
    %c0_6 = arith.constant 0 : index
    %3 = vector.load %arg2[%c0_5, %c0_6] : memref<32x32xf32, #tpu.memory_space<vmem>>, vector<32x32xf32>
    %cst = arith.constant dense<0.000000e+00> : vector<8x32xf32>
    %4 = tpu.matmul %2, %3, %cst {dimension_numbers = #tpu.dot_dimension_numbers<[1], [0], [0], [1], [0, 0, 1, 1], [], []>} : vector<8x32xf32>, vector<32x32xf32>, vector<8x32xf32> -> vector<8x32xf32>
    %c0_7 = arith.constant 0 : index
    %c0_8 = arith.constant 0 : index
    %5 = vector.load %arg3[%c0_7, %c0_8] : memref<1x32xf32, #tpu.memory_space<vmem>>, vector<1x32xf32>
    %6 = vector.broadcast %5 : vector<1x32xf32> to vector<8x32xf32>
    %7 = arith.addf %4, %6 : vector<8x32xf32>
    %c0_9 = arith.constant 0 : index
    %c0_10 = arith.constant 0 : index
    %8 = vector.load %arg4[%c0_9, %c0_10] : memref<8x32xf32, #tpu.memory_space<vmem>>, vector<8x32xf32>
    %9 = arith.addf %7, %8 : vector<8x32xf32>
    %c1 = arith.constant 1 : index
    %c0_11 = arith.constant 0 : index
    %c0_12 = arith.constant 0 : index
    %10 = vector.load %arg5[%c1, %c0_11, %c0_12] : memref<2x32x32xf32, #tpu.memory_space<vmem>>, vector<1x32x32xf32>
    %11 = vector.shape_cast %10 : vector<1x32x32xf32> to vector<32x32xf32>
    %c1_13 = arith.constant 1 : index
    %c0_14 = arith.constant 0 : index
    %c0_15 = arith.constant 0 : index
    %12 = vector.load %arg6[%c1_13, %c0_14, %c0_15] : memref<2x1x32xf32, #tpu.memory_space<vmem>>, vector<1x1x32xf32>
    %13 = vector.shape_cast %12 : vector<1x1x32xf32> to vector<1x32xf32>
    %c1_16 = arith.constant 1 : index
    %c0_17 = arith.constant 0 : index
    %c0_18 = arith.constant 0 : index
    %14 = vector.load %arg7[%c1_16, %c0_17, %c0_18] : memref<2x32x32xf32, #tpu.memory_space<vmem>>, vector<1x32x32xf32>
    %15 = vector.shape_cast %14 : vector<1x32x32xf32> to vector<32x32xf32>
    %c1_19 = arith.constant 1 : index
    %c0_20 = arith.constant 0 : index
    %c0_21 = arith.constant 0 : index
    %16 = vector.load %arg8[%c1_19, %c0_20, %c0_21] : memref<2x1x32xf32, #tpu.memory_space<vmem>>, vector<1x1x32xf32>
    %17 = vector.shape_cast %16 : vector<1x1x32xf32> to vector<1x32xf32>
    %c1_22 = arith.constant 1 : index
    %c0_23 = arith.constant 0 : index
    %c0_24 = arith.constant 0 : index
    %18 = vector.load %arg9[%c1_22, %c0_23, %c0_24] : memref<2x32x32xf32, #tpu.memory_space<vmem>>, vector<1x32x32xf32>
    %19 = vector.shape_cast %18 : vector<1x32x32xf32> to vector<32x32xf32>
    %c1_25 = arith.constant 1 : index
    %c0_26 = arith.constant 0 : index
    %c0_27 = arith.constant 0 : index
    %20 = vector.load %arg10[%c1_25, %c0_26, %c0_27] : memref<2x1x32xf32, #tpu.memory_space<vmem>>, vector<1x1x32xf32>
    %21 = vector.shape_cast %20 : vector<1x1x32xf32> to vector<1x32xf32>
    %cst_28 = arith.constant dense<0.000000e+00> : vector<8x32xf32>
    %22 = tpu.matmul %9, %11, %cst_28 {dimension_numbers = #tpu.dot_dimension_numbers<[1], [0], [0], [1], [0, 0, 1, 1], [], []>} : vector<8x32xf32>, vector<32x32xf32>, vector<8x32xf32> -> vector<8x32xf32>
    %23 = vector.broadcast %13 : vector<1x32xf32> to vector<8x32xf32>
    %24 = arith.addf %22, %23 : vector<8x32xf32>
    %cst_29 = arith.constant dense<0.000000e+00> : vector<8x32xf32>
    %25 = tpu.matmul %9, %15, %cst_29 {dimension_numbers = #tpu.dot_dimension_numbers<[1], [0], [0], [1], [0, 0, 1, 1], [], []>} : vector<8x32xf32>, vector<32x32xf32>, vector<8x32xf32> -> vector<8x32xf32>
    %26 = vector.broadcast %17 : vector<1x32xf32> to vector<8x32xf32>
    %27 = arith.addf %25, %26 : vector<8x32xf32>
    %cst_30 = arith.constant dense<0.000000e+00> : vector<8x32xf32>
    %28 = tpu.matmul %9, %19, %cst_30 {dimension_numbers = #tpu.dot_dimension_numbers<[1], [0], [0], [1], [0, 0, 1, 1], [], []>} : vector<8x32xf32>, vector<32x32xf32>, vector<8x32xf32> -> vector<8x32xf32>
    %29 = vector.broadcast %21 : vector<1x32xf32> to vector<8x32xf32>
    %30 = arith.addf %28, %29 : vector<8x32xf32>
    %31 = vector.extract_strided_slice %24 {offsets = [0, 0], sizes = [8, 16], strides = [1, 1]} : vector<8x32xf32> to vector<8x16xf32>
    %32 = vector.extract_strided_slice %27 {offsets = [0, 0], sizes = [8, 16], strides = [1, 1]} : vector<8x32xf32> to vector<8x16xf32>
    %33 = vector.extract_strided_slice %30 {offsets = [0, 0], sizes = [8, 16], strides = [1, 1]} : vector<8x32xf32> to vector<8x16xf32>
    %cst_31 = arith.constant dense<0.000000e+00> : vector<8x8xf32>
    %34 = tpu.matmul %31, %32, %cst_31 {dimension_numbers = #tpu.dot_dimension_numbers<[1], [1], [0], [0], [0, 0, 1, 0], [], []>} : vector<8x16xf32>, vector<8x16xf32>, vector<8x8xf32> -> vector<8x8xf32>
    %cst_32 = arith.constant 3.125000e-02 : f32
    %35 = vector.broadcast %cst_32 : f32 to vector<8x8xf32>
    %36 = arith.mulf %34, %35 : vector<8x8xf32>
    %37 = tpu.iota {dimensions = array<i32: 0>} : vector<8x8xi32>
    %38 = tpu.iota {dimensions = array<i32: 1>} : vector<8x8xi32>
    %39 = arith.cmpi sgt, %38, %37 : vector<8x8xi32>
    %cst_33 = arith.constant 0xFF800000 : f32
    %40 = vector.broadcast %cst_33 : f32 to vector<8x8xf32>
    %41 = arith.select %39, %40, %36 : vector<8x8xi1>, vector<8x8xf32>
    %cst_34 = arith.constant dense<0xFF800000> : vector<8xf32>
    %42 = vector.multi_reduction <maximumf>, %41, %cst_34 [1] : vector<8x8xf32> to vector<8xf32>
    %cst_35 = arith.constant 0xFF800000 : f32
    %43 = vector.broadcast %cst_35 : f32 to vector<8xf32>
    %44 = arith.maximumf %43, %42 : vector<8xf32>
    %45 = vector.shape_cast %44 : vector<8xf32> to vector<8x1xf32>
    %46 = vector.broadcast %45 : vector<8x1xf32> to vector<8x8xf32>
    %47 = arith.subf %41, %46 : vector<8x8xf32>
    %48 = math.exp %47 : vector<8x8xf32>
    %cst_36 = arith.constant dense<0.000000e+00> : vector<8xf32>
    %49 = vector.multi_reduction <add>, %48, %cst_36 [1] : vector<8x8xf32> to vector<8xf32>
    %50 = vector.shape_cast %49 : vector<8xf32> to vector<8x1xf32>
    %51 = vector.broadcast %50 : vector<8x1xf32> to vector<8x8xf32>
    %52 = arith.divf %48, %51 : vector<8x8xf32>
    %cst_37 = arith.constant dense<0.000000e+00> : vector<8x16xf32>
    %53 = tpu.matmul %52, %33, %cst_37 {dimension_numbers = #tpu.dot_dimension_numbers<[1], [0], [0], [1], [0, 0, 1, 1], [], []>} : vector<8x8xf32>, vector<8x16xf32>, vector<8x16xf32> -> vector<8x16xf32>
    %54 = vector.extract_strided_slice %24 {offsets = [0, 16], sizes = [8, 16], strides = [1, 1]} : vector<8x32xf32> to vector<8x16xf32>
    %55 = vector.extract_strided_slice %27 {offsets = [0, 16], sizes = [8, 16], strides = [1, 1]} : vector<8x32xf32> to vector<8x16xf32>
    %56 = vector.extract_strided_slice %30 {offsets = [0, 16], sizes = [8, 16], strides = [1, 1]} : vector<8x32xf32> to vector<8x16xf32>
    %cst_38 = arith.constant dense<0.000000e+00> : vector<8x8xf32>
    %57 = tpu.matmul %54, %55, %cst_38 {dimension_numbers = #tpu.dot_dimension_numbers<[1], [1], [0], [0], [0, 0, 1, 0], [], []>} : vector<8x16xf32>, vector<8x16xf32>, vector<8x8xf32> -> vector<8x8xf32>
    %cst_39 = arith.constant 3.125000e-02 : f32
    %58 = vector.broadcast %cst_39 : f32 to vector<8x8xf32>
    %59 = arith.mulf %57, %58 : vector<8x8xf32>
    %60 = tpu.iota {dimensions = array<i32: 0>} : vector<8x8xi32>
    %61 = tpu.iota {dimensions = array<i32: 1>} : vector<8x8xi32>
    %62 = arith.cmpi sgt, %61, %60 : vector<8x8xi32>
    %cst_40 = arith.constant 0xFF800000 : f32
    %63 = vector.broadcast %cst_40 : f32 to vector<8x8xf32>
    %64 = arith.select %62, %63, %59 : vector<8x8xi1>, vector<8x8xf32>
    %cst_41 = arith.constant dense<0xFF800000> : vector<8xf32>
    %65 = vector.multi_reduction <maximumf>, %64, %cst_41 [1] : vector<8x8xf32> to vector<8xf32>
    %cst_42 = arith.constant 0xFF800000 : f32
    %66 = vector.broadcast %cst_42 : f32 to vector<8xf32>
    %67 = arith.maximumf %66, %65 : vector<8xf32>
    %68 = vector.shape_cast %67 : vector<8xf32> to vector<8x1xf32>
    %69 = vector.broadcast %68 : vector<8x1xf32> to vector<8x8xf32>
    %70 = arith.subf %64, %69 : vector<8x8xf32>
    %71 = math.exp %70 : vector<8x8xf32>
    %cst_43 = arith.constant dense<0.000000e+00> : vector<8xf32>
    %72 = vector.multi_reduction <add>, %71, %cst_43 [1] : vector<8x8xf32> to vector<8xf32>
    %73 = vector.shape_cast %72 : vector<8xf32> to vector<8x1xf32>
    %74 = vector.broadcast %73 : vector<8x1xf32> to vector<8x8xf32>
    %75 = arith.divf %71, %74 : vector<8x8xf32>
    %cst_44 = arith.constant dense<0.000000e+00> : vector<8x16xf32>
    %76 = tpu.matmul %75, %56, %cst_44 {dimension_numbers = #tpu.dot_dimension_numbers<[1], [0], [0], [1], [0, 0, 1, 1], [], []>} : vector<8x8xf32>, vector<8x16xf32>, vector<8x16xf32> -> vector<8x16xf32>
    %77 = tpu.concatenate %53, %76 in 1 : vector<8x16xf32>, vector<8x16xf32> -> vector<8x32xf32>
    %78 = arith.addf %9, %77 : vector<8x32xf32>
    %cst_45 = arith.constant dense<0.000000e+00> : vector<8xf32>
    %79 = vector.multi_reduction <add>, %78, %cst_45 [1] : vector<8x32xf32> to vector<8xf32>
    %80 = vector.shape_cast %79 : vector<8xf32> to vector<8x1xf32>
    %cst_46 = arith.constant 3.200000e+01 : f32
    %81 = vector.broadcast %cst_46 : f32 to vector<8x1xf32>
    %82 = arith.divf %80, %81 : vector<8x1xf32>
    %83 = vector.broadcast %82 : vector<8x1xf32> to vector<8x32xf32>
    %84 = arith.subf %78, %83 : vector<8x32xf32>
    %85 = arith.mulf %84, %84 : vector<8x32xf32>
    %cst_47 = arith.constant dense<0.000000e+00> : vector<8xf32>
    %86 = vector.multi_reduction <add>, %85, %cst_47 [1] : vector<8x32xf32> to vector<8xf32>
    %87 = vector.shape_cast %86 : vector<8xf32> to vector<8x1xf32>
    %cst_48 = arith.constant 3.200000e+01 : f32
    %88 = vector.broadcast %cst_48 : f32 to vector<8x1xf32>
    %89 = arith.divf %87, %88 : vector<8x1xf32>
    %90 = vector.broadcast %82 : vector<8x1xf32> to vector<8x32xf32>
    %91 = arith.subf %78, %90 : vector<8x32xf32>
    %cst_49 = arith.constant 9.99999974E-6 : f32
    %92 = vector.broadcast %cst_49 : f32 to vector<8x1xf32>
    %93 = arith.addf %89, %92 : vector<8x1xf32>
    %94 = math.rsqrt %93 : vector<8x1xf32>
    %95 = vector.broadcast %94 : vector<8x1xf32> to vector<8x32xf32>
    %96 = arith.mulf %91, %95 : vector<8x32xf32>
    %97 = vector.broadcast %0 : vector<1x32xf32> to vector<8x32xf32>
    %98 = arith.mulf %96, %97 : vector<8x32xf32>
    %99 = vector.broadcast %1 : vector<1x32xf32> to vector<8x32xf32>
    %100 = arith.addf %98, %99 : vector<8x32xf32>
    %c1_50 = arith.constant 1 : index
    %c0_51 = arith.constant 0 : index
    %c0_52 = arith.constant 0 : index
    %101 = vector.load %arg11[%c1_50, %c0_51, %c0_52] : memref<2x32x32xf32, #tpu.memory_space<vmem>>, vector<1x32x32xf32>
    %102 = vector.shape_cast %101 : vector<1x32x32xf32> to vector<32x32xf32>
    %c1_53 = arith.constant 1 : index
    %c0_54 = arith.constant 0 : index
    %c0_55 = arith.constant 0 : index
    %103 = vector.load %arg12[%c1_53, %c0_54, %c0_55] : memref<2x1x32xf32, #tpu.memory_space<vmem>>, vector<1x1x32xf32>
    %104 = vector.shape_cast %103 : vector<1x1x32xf32> to vector<1x32xf32>
    %c1_56 = arith.constant 1 : index
    %c0_57 = arith.constant 0 : index
    %c0_58 = arith.constant 0 : index
    %105 = vector.load %arg13[%c1_56, %c0_57, %c0_58] : memref<2x32x32xf32, #tpu.memory_space<vmem>>, vector<1x32x32xf32>
    %106 = vector.shape_cast %105 : vector<1x32x32xf32> to vector<32x32xf32>
    %c1_59 = arith.constant 1 : index
    %c0_60 = arith.constant 0 : index
    %c0_61 = arith.constant 0 : index
    %107 = vector.load %arg14[%c1_59, %c0_60, %c0_61] : memref<2x1x32xf32, #tpu.memory_space<vmem>>, vector<1x1x32xf32>
    %108 = vector.shape_cast %107 : vector<1x1x32xf32> to vector<1x32xf32>
    %c1_62 = arith.constant 1 : index
    %c0_63 = arith.constant 0 : index
    %c0_64 = arith.constant 0 : index
    %109 = vector.load %arg15[%c1_62, %c0_63, %c0_64] : memref<2x32x32xf32, #tpu.memory_space<vmem>>, vector<1x32x32xf32>
    %110 = vector.shape_cast %109 : vector<1x32x32xf32> to vector<32x32xf32>
    %c1_65 = arith.constant 1 : index
    %c0_66 = arith.constant 0 : index
    %c0_67 = arith.constant 0 : index
    %111 = vector.load %arg16[%c1_65, %c0_66, %c0_67] : memref<2x1x32xf32, #tpu.memory_space<vmem>>, vector<1x1x32xf32>
    %112 = vector.shape_cast %111 : vector<1x1x32xf32> to vector<1x32xf32>
    %cst_68 = arith.constant dense<0.000000e+00> : vector<8x32xf32>
    %113 = tpu.matmul %100, %102, %cst_68 {dimension_numbers = #tpu.dot_dimension_numbers<[1], [0], [0], [1], [0, 0, 1, 1], [], []>} : vector<8x32xf32>, vector<32x32xf32>, vector<8x32xf32> -> vector<8x32xf32>
    %114 = vector.broadcast %104 : vector<1x32xf32> to vector<8x32xf32>
    %115 = arith.addf %113, %114 : vector<8x32xf32>
    %cst_69 = arith.constant dense<0.000000e+00> : vector<8x32xf32>
    %116 = tpu.matmul %100, %106, %cst_69 {dimension_numbers = #tpu.dot_dimension_numbers<[1], [0], [0], [1], [0, 0, 1, 1], [], []>} : vector<8x32xf32>, vector<32x32xf32>, vector<8x32xf32> -> vector<8x32xf32>
    %117 = vector.broadcast %108 : vector<1x32xf32> to vector<8x32xf32>
    %118 = arith.addf %116, %117 : vector<8x32xf32>
    %cst_70 = arith.constant dense<0.000000e+00> : vector<8x32xf32>
    %119 = tpu.matmul %100, %110, %cst_70 {dimension_numbers = #tpu.dot_dimension_numbers<[1], [0], [0], [1], [0, 0, 1, 1], [], []>} : vector<8x32xf32>, vector<32x32xf32>, vector<8x32xf32> -> vector<8x32xf32>
    %120 = vector.broadcast %112 : vector<1x32xf32> to vector<8x32xf32>
    %121 = arith.addf %119, %120 : vector<8x32xf32>
    %122 = vector.extract_strided_slice %115 {offsets = [0, 0], sizes = [8, 16], strides = [1, 1]} : vector<8x32xf32> to vector<8x16xf32>
    %123 = vector.extract_strided_slice %118 {offsets = [0, 0], sizes = [8, 16], strides = [1, 1]} : vector<8x32xf32> to vector<8x16xf32>
    %124 = vector.extract_strided_slice %121 {offsets = [0, 0], sizes = [8, 16], strides = [1, 1]} : vector<8x32xf32> to vector<8x16xf32>
    %cst_71 = arith.constant dense<0.000000e+00> : vector<8x8xf32>
    %125 = tpu.matmul %122, %123, %cst_71 {dimension_numbers = #tpu.dot_dimension_numbers<[1], [1], [0], [0], [0, 0, 1, 0], [], []>} : vector<8x16xf32>, vector<8x16xf32>, vector<8x8xf32> -> vector<8x8xf32>
    %cst_72 = arith.constant 3.125000e-02 : f32
    %126 = vector.broadcast %cst_72 : f32 to vector<8x8xf32>
    %127 = arith.mulf %125, %126 : vector<8x8xf32>
    %cst_73 = arith.constant dense<0xFF800000> : vector<8xf32>
    %128 = vector.multi_reduction <maximumf>, %127, %cst_73 [1] : vector<8x8xf32> to vector<8xf32>
    %cst_74 = arith.constant 0xFF800000 : f32
    %129 = vector.broadcast %cst_74 : f32 to vector<8xf32>
    %130 = arith.maximumf %129, %128 : vector<8xf32>
    %131 = vector.shape_cast %130 : vector<8xf32> to vector<8x1xf32>
    %132 = vector.broadcast %131 : vector<8x1xf32> to vector<8x8xf32>
    %133 = arith.subf %127, %132 : vector<8x8xf32>
    %134 = math.exp %133 : vector<8x8xf32>
    %cst_75 = arith.constant dense<0.000000e+00> : vector<8xf32>
    %135 = vector.multi_reduction <add>, %134, %cst_75 [1] : vector<8x8xf32> to vector<8xf32>
    %136 = vector.shape_cast %135 : vector<8xf32> to vector<8x1xf32>
    %137 = vector.broadcast %136 : vector<8x1xf32> to vector<8x8xf32>
    %138 = arith.divf %134, %137 : vector<8x8xf32>
    %cst_76 = arith.constant dense<0.000000e+00> : vector<8x16xf32>
    %139 = tpu.matmul %138, %124, %cst_76 {dimension_numbers = #tpu.dot_dimension_numbers<[1], [0], [0], [1], [0, 0, 1, 1], [], []>} : vector<8x8xf32>, vector<8x16xf32>, vector<8x16xf32> -> vector<8x16xf32>
    %140 = vector.extract_strided_slice %115 {offsets = [0, 16], sizes = [8, 16], strides = [1, 1]} : vector<8x32xf32> to vector<8x16xf32>
    %141 = vector.extract_strided_slice %118 {offsets = [0, 16], sizes = [8, 16], strides = [1, 1]} : vector<8x32xf32> to vector<8x16xf32>
    %142 = vector.extract_strided_slice %121 {offsets = [0, 16], sizes = [8, 16], strides = [1, 1]} : vector<8x32xf32> to vector<8x16xf32>
    %cst_77 = arith.constant dense<0.000000e+00> : vector<8x8xf32>
    %143 = tpu.matmul %140, %141, %cst_77 {dimension_numbers = #tpu.dot_dimension_numbers<[1], [1], [0], [0], [0, 0, 1, 0], [], []>} : vector<8x16xf32>, vector<8x16xf32>, vector<8x8xf32> -> vector<8x8xf32>
    %cst_78 = arith.constant 3.125000e-02 : f32
    %144 = vector.broadcast %cst_78 : f32 to vector<8x8xf32>
    %145 = arith.mulf %143, %144 : vector<8x8xf32>
    %cst_79 = arith.constant dense<0xFF800000> : vector<8xf32>
    %146 = vector.multi_reduction <maximumf>, %145, %cst_79 [1] : vector<8x8xf32> to vector<8xf32>
    %cst_80 = arith.constant 0xFF800000 : f32
    %147 = vector.broadcast %cst_80 : f32 to vector<8xf32>
    %148 = arith.maximumf %147, %146 : vector<8xf32>
    %149 = vector.shape_cast %148 : vector<8xf32> to vector<8x1xf32>
    %150 = vector.broadcast %149 : vector<8x1xf32> to vector<8x8xf32>
    %151 = arith.subf %145, %150 : vector<8x8xf32>
    %152 = math.exp %151 : vector<8x8xf32>
    %cst_81 = arith.constant dense<0.000000e+00> : vector<8xf32>
    %153 = vector.multi_reduction <add>, %152, %cst_81 [1] : vector<8x8xf32> to vector<8xf32>
    %154 = vector.shape_cast %153 : vector<8xf32> to vector<8x1xf32>
    %155 = vector.broadcast %154 : vector<8x1xf32> to vector<8x8xf32>
    %156 = arith.divf %152, %155 : vector<8x8xf32>
    %cst_82 = arith.constant dense<0.000000e+00> : vector<8x16xf32>
    %157 = tpu.matmul %156, %142, %cst_82 {dimension_numbers = #tpu.dot_dimension_numbers<[1], [0], [0], [1], [0, 0, 1, 1], [], []>} : vector<8x8xf32>, vector<8x16xf32>, vector<8x16xf32> -> vector<8x16xf32>
    %158 = tpu.concatenate %139, %157 in 1 : vector<8x16xf32>, vector<8x16xf32> -> vector<8x32xf32>
    %159 = arith.addf %100, %158 : vector<8x32xf32>
    %cst_83 = arith.constant dense<0.000000e+00> : vector<8xf32>
    %160 = vector.multi_reduction <add>, %159, %cst_83 [1] : vector<8x32xf32> to vector<8xf32>
    %161 = vector.shape_cast %160 : vector<8xf32> to vector<8x1xf32>
    %cst_84 = arith.constant 3.200000e+01 : f32
    %162 = vector.broadcast %cst_84 : f32 to vector<8x1xf32>
    %163 = arith.divf %161, %162 : vector<8x1xf32>
    %164 = vector.broadcast %163 : vector<8x1xf32> to vector<8x32xf32>
    %165 = arith.subf %159, %164 : vector<8x32xf32>
    %166 = arith.mulf %165, %165 : vector<8x32xf32>
    %cst_85 = arith.constant dense<0.000000e+00> : vector<8xf32>
    %167 = vector.multi_reduction <add>, %166, %cst_85 [1] : vector<8x32xf32> to vector<8xf32>
    %168 = vector.shape_cast %167 : vector<8xf32> to vector<8x1xf32>
    %cst_86 = arith.constant 3.200000e+01 : f32
    %169 = vector.broadcast %cst_86 : f32 to vector<8x1xf32>
    %170 = arith.divf %168, %169 : vector<8x1xf32>
    %171 = vector.broadcast %163 : vector<8x1xf32> to vector<8x32xf32>
    %172 = arith.subf %159, %171 : vector<8x32xf32>
    %cst_87 = arith.constant 9.99999974E-6 : f32
    %173 = vector.broadcast %cst_87 : f32 to vector<8x1xf32>
    %174 = arith.addf %170, %173 : vector<8x1xf32>
    %175 = math.rsqrt %174 : vector<8x1xf32>
    %176 = vector.broadcast %175 : vector<8x1xf32> to vector<8x32xf32>
    %177 = arith.mulf %172, %176 : vector<8x32xf32>
    %178 = vector.broadcast %0 : vector<1x32xf32> to vector<8x32xf32>
    %179 = arith.mulf %177, %178 : vector<8x32xf32>
    %180 = vector.broadcast %1 : vector<1x32xf32> to vector<8x32xf32>
    %181 = arith.addf %179, %180 : vector<8x32xf32>
    %c1_88 = arith.constant 1 : index
    %c0_89 = arith.constant 0 : index
    %c0_90 = arith.constant 0 : index
    %182 = vector.load %arg17[%c1_88, %c0_89, %c0_90] : memref<2x32x64xf32, #tpu.memory_space<vmem>>, vector<1x32x64xf32>
    %183 = vector.shape_cast %182 : vector<1x32x64xf32> to vector<32x64xf32>
    %cst_91 = arith.constant dense<0.000000e+00> : vector<8x64xf32>
    %184 = tpu.matmul %181, %183, %cst_91 {dimension_numbers = #tpu.dot_dimension_numbers<[1], [0], [0], [1], [0, 0, 1, 1], [], []>} : vector<8x32xf32>, vector<32x64xf32>, vector<8x64xf32> -> vector<8x64xf32>
    %c1_92 = arith.constant 1 : index
    %c0_93 = arith.constant 0 : index
    %c0_94 = arith.constant 0 : index
    %185 = vector.load %arg18[%c1_92, %c0_93, %c0_94] : memref<2x1x64xf32, #tpu.memory_space<vmem>>, vector<1x1x64xf32>
    %186 = vector.shape_cast %185 : vector<1x1x64xf32> to vector<1x64xf32>
    %187 = vector.broadcast %186 : vector<1x64xf32> to vector<8x64xf32>
    %188 = arith.addf %184, %187 : vector<8x64xf32>
    %cst_95 = arith.constant 0.000000e+00 : f32
    %189 = vector.broadcast %cst_95 : f32 to vector<8x64xf32>
    %190 = arith.maximumf %188, %189 : vector<8x64xf32>
    %c1_96 = arith.constant 1 : index
    %c0_97 = arith.constant 0 : index
    %c0_98 = arith.constant 0 : index
    %191 = vector.load %arg19[%c1_96, %c0_97, %c0_98] : memref<2x64x32xf32, #tpu.memory_space<vmem>>, vector<1x64x32xf32>
    %192 = vector.shape_cast %191 : vector<1x64x32xf32> to vector<64x32xf32>
    %cst_99 = arith.constant dense<0.000000e+00> : vector<8x32xf32>
    %193 = tpu.matmul %190, %192, %cst_99 {dimension_numbers = #tpu.dot_dimension_numbers<[1], [0], [0], [1], [0, 0, 1, 1], [], []>} : vector<8x64xf32>, vector<64x32xf32>, vector<8x32xf32> -> vector<8x32xf32>
    %c1_100 = arith.constant 1 : index
    %c0_101 = arith.constant 0 : index
    %c0_102 = arith.constant 0 : index
    %194 = vector.load %arg20[%c1_100, %c0_101, %c0_102] : memref<2x1x32xf32, #tpu.memory_space<vmem>>, vector<1x1x32xf32>
    %195 = vector.shape_cast %194 : vector<1x1x32xf32> to vector<1x32xf32>
    %196 = vector.broadcast %195 : vector<1x32xf32> to vector<8x32xf32>
    %197 = arith.addf %193, %196 : vector<8x32xf32>
    %198 = arith.addf %181, %197 : vector<8x32xf32>
    %cst_103 = arith.constant dense<0.000000e+00> : vector<8xf32>
    %199 = vector.multi_reduction <add>, %198, %cst_103 [1] : vector<8x32xf32> to vector<8xf32>
    %200 = vector.shape_cast %199 : vector<8xf32> to vector<8x1xf32>
    %cst_104 = arith.constant 3.200000e+01 : f32
    %201 = vector.broadcast %cst_104 : f32 to vector<8x1xf32>
    %202 = arith.divf %200, %201 : vector<8x1xf32>
    %203 = vector.broadcast %202 : vector<8x1xf32> to vector<8x32xf32>
    %204 = arith.subf %198, %203 : vector<8x32xf32>
    %205 = arith.mulf %204, %204 : vector<8x32xf32>
    %cst_105 = arith.constant dense<0.000000e+00> : vector<8xf32>
    %206 = vector.multi_reduction <add>, %205, %cst_105 [1] : vector<8x32xf32> to vector<8xf32>
    %207 = vector.shape_cast %206 : vector<8xf32> to vector<8x1xf32>
    %cst_106 = arith.constant 3.200000e+01 : f32
    %208 = vector.broadcast %cst_106 : f32 to vector<8x1xf32>
    %209 = arith.divf %207, %208 : vector<8x1xf32>
    %210 = vector.broadcast %202 : vector<8x1xf32> to vector<8x32xf32>
    %211 = arith.subf %198, %210 : vector<8x32xf32>
    %cst_107 = arith.constant 9.99999974E-6 : f32
    %212 = vector.broadcast %cst_107 : f32 to vector<8x1xf32>
    %213 = arith.addf %209, %212 : vector<8x1xf32>
    %214 = math.rsqrt %213 : vector<8x1xf32>
    %215 = vector.broadcast %214 : vector<8x1xf32> to vector<8x32xf32>
    %216 = arith.mulf %211, %215 : vector<8x32xf32>
    %217 = vector.broadcast %0 : vector<1x32xf32> to vector<8x32xf32>
    %218 = arith.mulf %216, %217 : vector<8x32xf32>
    %219 = vector.broadcast %1 : vector<1x32xf32> to vector<8x32xf32>
    %220 = arith.addf %218, %219 : vector<8x32xf32>
    %c0_108 = arith.constant 0 : index
    %c0_109 = arith.constant 0 : index
    %221 = vector.load %arg23[%c0_108, %c0_109] : memref<32x32xf32, #tpu.memory_space<vmem>>, vector<32x32xf32>
    %cst_110 = arith.constant dense<0.000000e+00> : vector<8x32xf32>
    %222 = tpu.matmul %220, %221, %cst_110 {dimension_numbers = #tpu.dot_dimension_numbers<[1], [0], [0], [1], [0, 0, 1, 1], [], []>} : vector<8x32xf32>, vector<32x32xf32>, vector<8x32xf32> -> vector<8x32xf32>
    %c0_111 = arith.constant 0 : index
    %c0_112 = arith.constant 0 : index
    %223 = vector.load %arg24[%c0_111, %c0_112] : memref<1x32xf32, #tpu.memory_space<vmem>>, vector<1x32xf32>
    %224 = vector.broadcast %223 : vector<1x32xf32> to vector<8x32xf32>
    %225 = arith.addf %222, %224 : vector<8x32xf32>
    %cst_113 = arith.constant dense<0xFF800000> : vector<8xf32>
    %226 = vector.multi_reduction <maximumf>, %225, %cst_113 [1] : vector<8x32xf32> to vector<8xf32>
    %cst_114 = arith.constant 0xFF800000 : f32
    %227 = vector.broadcast %cst_114 : f32 to vector<8xf32>
    %228 = arith.maximumf %227, %226 : vector<8xf32>
    %229 = vector.shape_cast %228 : vector<8xf32> to vector<8x1xf32>
    %230 = vector.broadcast %229 : vector<8x1xf32> to vector<8x32xf32>
    %231 = arith.subf %225, %230 : vector<8x32xf32>
    %232 = math.exp %231 : vector<8x32xf32>
    %cst_115 = arith.constant dense<0.000000e+00> : vector<8xf32>
    %233 = vector.multi_reduction <add>, %232, %cst_115 [1] : vector<8x32xf32> to vector<8xf32>
    %234 = vector.shape_cast %233 : vector<8xf32> to vector<8x1xf32>
    %235 = vector.broadcast %234 : vector<8x1xf32> to vector<8x32xf32>
    %236 = arith.divf %232, %235 : vector<8x32xf32>
    %c0_116 = arith.constant 0 : index
    %c0_117 = arith.constant 0 : index
    %237 = vector.load %arg25[%c0_116, %c0_117] : memref<8x32xf32, #tpu.memory_space<vmem>>, vector<8x32xf32>
    tpu.vector_store %arg25[%c0_116, %c0_117], %236 {strides = array<i32>} : memref<8x32xf32, #tpu.memory_space<vmem>>, vector<8x32xf32>,
    return
  }
  func.func @transform_0(%arg0: i32) -> (i32, i32) {
    %c0_i32 = arith.constant 0 : i32
    %c0_i32_0 = arith.constant 0 : i32
    %c0_i32_1 = arith.constant 0 : i32
    return %c0_i32, %c0_i32_0 : i32, i32
  }
  func.func @transform_1(%arg0: i32) -> (i32, i32) {
    %c0_i32 = arith.constant 0 : i32
    %c0_i32_0 = arith.constant 0 : i32
    %c0_i32_1 = arith.constant 0 : i32
    return %c0_i32, %c0_i32_0 : i32, i32
  }
  func.func @transform_2(%arg0: i32) -> (i32, i32) {
    %c0_i32 = arith.constant 0 : i32
    %c0_i32_0 = arith.constant 0 : i32
    %c0_i32_1 = arith.constant 0 : i32
    return %c0_i32, %c0_i32_0 : i32, i32
  }
  func.func @transform_3(%arg0: i32) -> (i32, i32) {
    %c0_i32 = arith.constant 0 : i32
    %c0_i32_0 = arith.constant 0 : i32
    %c0_i32_1 = arith.constant 0 : i32
    return %c0_i32, %c0_i32_0 : i32, i32
  }
  func.func @transform_4(%arg0: i32) -> (i32, i32, i32) {
    %c0_i32 = arith.constant 0 : i32
    %c0_i32_0 = arith.constant 0 : i32
    %c0_i32_1 = arith.constant 0 : i32
    %c0_i32_2 = arith.constant 0 : i32
    return %c0_i32, %c0_i32_0, %c0_i32_1 : i32, i32, i32
  }
  func.func @transform_5(%arg0: i32) -> (i32, i32, i32) {
    %c0_i32 = arith.constant 0 : i32
    %c0_i32_0 = arith.constant 0 : i32
    %c0_i32_1 = arith.constant 0 : i32
    %c0_i32_2 = arith.constant 0 : i32
    return %c0_i32, %c0_i32_0, %c0_i32_1 : i32, i32, i32
  }
  func.func @transform_6(%arg0: i32) -> (i32, i32, i32) {
    %c0_i32 = arith.constant 0 : i32
    %c0_i32_0 = arith.constant 0 : i32
    %c0_i32_1 = arith.constant 0 : i32
    %c0_i32_2 = arith.constant 0 : i32
    return %c0_i32, %c0_i32_0, %c0_i32_1 : i32, i32, i32
  }
  func.func @transform_7(%arg0: i32) -> (i32, i32, i32) {
    %c0_i32 = arith.constant 0 : i32
    %c0_i32_0 = arith.constant 0 : i32
    %c0_i32_1 = arith.constant 0 : i32
    %c0_i32_2 = arith.constant 0 : i32
    return %c0_i32, %c0_i32_0, %c0_i32_1 : i32, i32, i32
  }
  func.func @transform_8(%arg0: i32) -> (i32, i32, i32) {
    %c0_i32 = arith.constant 0 : i32
    %c0_i32_0 = arith.constant 0 : i32
    %c0_i32_1 = arith.constant 0 : i32
    %c0_i32_2 = arith.constant 0 : i32
    return %c0_i32, %c0_i32_0, %c0_i32_1 : i32, i32, i32
  }
  func.func @transform_9(%arg0: i32) -> (i32, i32, i32) {
    %c0_i32 = arith.constant 0 : i32
    %c0_i32_0 = arith.constant 0 : i32
    %c0_i32_1 = arith.constant 0 : i32
    %c0_i32_2 = arith.constant 0 : i32
    return %c0_i32, %c0_i32_0, %c0_i32_1 : i32, i32, i32
  }
  func.func @transform_10(%arg0: i32) -> (i32, i32, i32) {
    %c0_i32 = arith.constant 0 : i32
    %c0_i32_0 = arith.constant 0 : i32
    %c0_i32_1 = arith.constant 0 : i32
    %c0_i32_2 = arith.constant 0 : i32
    return %c0_i32, %c0_i32_0, %c0_i32_1 : i32, i32, i32
  }
  func.func @transform_11(%arg0: i32) -> (i32, i32, i32) {
    %c0_i32 = arith.constant 0 : i32
    %c0_i32_0 = arith.constant 0 : i32
    %c0_i32_1 = arith.constant 0 : i32
    %c0_i32_2 = arith.constant 0 : i32
    return %c0_i32, %c0_i32_0, %c0_i32_1 : i32, i32, i32
  }
  func.func @transform_12(%arg0: i32) -> (i32, i32, i32) {
    %c0_i32 = arith.constant 0 : i32
    %c0_i32_0 = arith.constant 0 : i32
    %c0_i32_1 = arith.constant 0 : i32
    %c0_i32_2 = arith.constant 0 : i32
    return %c0_i32, %c0_i32_0, %c0_i32_1 : i32, i32, i32
  }
  func.func @transform_13(%arg0: i32) -> (i32, i32, i32) {
    %c0_i32 = arith.constant 0 : i32
    %c0_i32_0 = arith.constant 0 : i32
    %c0_i32_1 = arith.constant 0 : i32
    %c0_i32_2 = arith.constant 0 : i32
    return %c0_i32, %c0_i32_0, %c0_i32_1 : i32, i32, i32
  }
  func.func @transform_14(%arg0: i32) -> (i32, i32, i32) {
    %c0_i32 = arith.constant 0 : i32
    %c0_i32_0 = arith.constant 0 : i32
    %c0_i32_1 = arith.constant 0 : i32
    %c0_i32_2 = arith.constant 0 : i32
    return %c0_i32, %c0_i32_0, %c0_i32_1 : i32, i32, i32
  }
  func.func @transform_15(%arg0: i32) -> (i32, i32, i32) {
    %c0_i32 = arith.constant 0 : i32
    %c0_i32_0 = arith.constant 0 : i32
    %c0_i32_1 = arith.constant 0 : i32
    %c0_i32_2 = arith.constant 0 : i32
    return %c0_i32, %c0_i32_0, %c0_i32_1 : i32, i32, i32
  }
  func.func @transform_16(%arg0: i32) -> (i32, i32, i32) {
    %c0_i32 = arith.constant 0 : i32
    %c0_i32_0 = arith.constant 0 : i32
    %c0_i32_1 = arith.constant 0 : i32
    %c0_i32_2 = arith.constant 0 : i32
    return %c0_i32, %c0_i32_0, %c0_i32_1 : i32, i32, i32
  }
  func.func @transform_17(%arg0: i32) -> (i32, i32, i32) {
    %c0_i32 = arith.constant 0 : i32
    %c0_i32_0 = arith.constant 0 : i32
    %c0_i32_1 = arith.constant 0 : i32
    %c0_i32_2 = arith.constant 0 : i32
    return %c0_i32, %c0_i32_0, %c0_i32_1 : i32, i32, i32
  }
  func.func @transform_18(%arg0: i32) -> (i32, i32, i32) {
    %c0_i32 = arith.constant 0 : i32
    %c0_i32_0 = arith.constant 0 : i32
    %c0_i32_1 = arith.constant 0 : i32
    %c0_i32_2 = arith.constant 0 : i32
    return %c0_i32, %c0_i32_0, %c0_i32_1 : i32, i32, i32
  }
  func.func @transform_19(%arg0: i32) -> (i32, i32, i32) {
    %c0_i32 = arith.constant 0 : i32
    %c0_i32_0 = arith.constant 0 : i32
    %c0_i32_1 = arith.constant 0 : i32
    %c0_i32_2 = arith.constant 0 : i32
    return %c0_i32, %c0_i32_0, %c0_i32_1 : i32, i32, i32
  }
  func.func @transform_20(%arg0: i32) -> (i32, i32) {
    %c0_i32 = arith.constant 0 : i32
    %c0_i32_0 = arith.constant 0 : i32
    %c0_i32_1 = arith.constant 0 : i32
    return %c0_i32, %c0_i32_0 : i32, i32
  }
  func.func @transform_21(%arg0: i32) -> (i32, i32) {
    %c0_i32 = arith.constant 0 : i32
    %c0_i32_0 = arith.constant 0 : i32
    %c0_i32_1 = arith.constant 0 : i32
    return %c0_i32, %c0_i32_0 : i32, i32
  }
  func.func @transform_22(%arg0: i32) -> (i32, i32) {
    %c0_i32 = arith.constant 0 : i32
    %c0_i32_0 = arith.constant 0 : i32
    %c0_i32_1 = arith.constant 0 : i32
    return %c0_i32, %c0_i32_0 : i32, i32
  }
  func.func @transform_23(%arg0: i32) -> (i32, i32) {
    %c0_i32 = arith.constant 0 : i32
    %c0_i32_0 = arith.constant 0 : i32
    %c0_i32_1 = arith.constant 0 : i32
    return %c0_i32, %c0_i32_0 : i32, i32
  }
  func.func @transform_24(%arg0: i32) -> (i32, i32) {
    %c0_i32 = arith.constant 0 : i32
    %c0_i32_0 = arith.constant 0 : i32
    %c0_i32_1 = arith.constant 0 : i32
    return %c0_i32, %c0_i32_0 : i32, i32
  }
}

</mosaic_0001>

<bundles_post_ra>
// kernel: tpu_custom_call.1
= control target key start
LH: loop header
LB: loop body
LE: loop exit
PB: predicated region body
PF: predicated region fallthrough
CT: control target
= control target key end

     0   :  { %s1715_s0 = inlined_call_operand.hbm [shape: f32[8,32], index: 0, kind: input, shape index: {}]   ;;  %s1716_s1 = inlined_call_operand.hbm [shape: f32[32,32], index: 1, kind: input, shape index: {}]   ;;  %s1717_s2 = inlined_call_operand.hbm [shape: f32[1,32], index: 2, kind: input, shape index: {}]   ;;  %s1718_s3 = inlined_call_operand.hbm [shape: f32[8,32], index: 3, kind: input, shape index: {}]   ;;  %s1719_s4 = inlined_call_operand.vmem [shape: f32[2,32,32], index: 4, kind: input, shape index: {}]   ;;  %s1720_s5 = inlined_call_operand.vmem [shape: f32[2,1,32], index: 5, kind: input, shape index: {}]   ;;  %s1721_s6 = inlined_call_operand.vmem [shape: f32[2,32,32], index: 6, kind: input, shape index: {}]   ;;  %s1722_s7 = inlined_call_operand.vmem [shape: f32[2,1,32], index: 7, kind: input, shape index: {}]   ;;  %s1723_s8 = inlined_call_operand.vmem [shape: f32[2,32,32], index: 8, kind: input, shape index: {}]   ;;  %s1724_s9 = inlined_call_operand.vmem [shape: f32[2,1,32], index: 9, kind: input, shape index: {}]   ;;  %s1725_s10 = inlined_call_operand.hbm [shape: f32[2,32,32], index: 10, kind: input, shape index: {}]   ;;  %s1726_s11 = inlined_call_operand.vmem [shape: f32[2,1,32], index: 11, kind: input, shape index: {}]   ;;  %s1727_s12 = inlined_call_operand.hbm [shape: f32[2,32,32], index: 12, kind: input, shape index: {}]   ;;  %s1728_s13 = inlined_call_operand.vmem [shape: f32[2,1,32], index: 13, kind: input, shape index: {}]   ;;  %s1729_s14 = inlined_call_operand.hbm [shape: f32[2,32,32], index: 14, kind: input, shape index: {}]   ;;  %s1730_s15 = inlined_call_operand.vmem [shape: f32[2,1,32], index: 15, kind: input, shape index: {}]   ;;  %s1731_s16 = inlined_call_operand.hbm [shape: f32[2,32,64], index: 16, kind: input, shape index: {}]   ;;  %s1732_s17 = inlined_call_operand.vmem [shape: f32[2,1,64], index: 17, kind: input, shape index: {}]   ;;  %s1733_s18 = inlined_call_operand.vmem [shape: f32[2,64,32], index: 18, kind: input, shape index: {}]   ;;  %s1734_s19 = inlined_call_operand.vmem [shape: f32[2,1,32], index: 19, kind: input, shape index: {}]   ;;  %s1735_s20 = inlined_call_operand.vmem [shape: f32[1,32], index: 20, kind: input, shape index: {}]   ;;  %s1736_s21 = inlined_call_operand.vmem [shape: f32[1,32], index: 21, kind: input, shape index: {}]   ;;  %s1737_s22 = inlined_call_operand.hbm [shape: f32[32,32], index: 22, kind: input, shape index: {}]   ;;  %s1738_s23 = inlined_call_operand.vmem [shape: f32[1,32], index: 23, kind: input, shape index: {}]   ;;  %s1739_s24 = inlined_call_operand.hbm [shape: f32[8,32], index: 24, kind: output, shape index: {}]  }
   0x1   :  { %1743 = sst [smem:[#allocation24_spill]] %s1715_s0 }
   0x2   :  { %1744 = sst [smem:[#allocation25_spill]] %s1716_s1 }
   0x3   :  { %1745 = sst [smem:[#allocation26_spill]] %s1717_s2 }
   0x4   :  { %1746 = sst [smem:[#allocation27_spill]] %s1718_s3 }
   0x5   :  { %1747 = sst [smem:[#allocation28_spill]] %s1719_s4 }
   0x6   :  { %1748 = sst [smem:[#allocation29_spill]] %s1720_s5 }
   0x7   :  { %1749 = sst [smem:[#allocation30_spill]] %s1721_s6 }
   0x8   :  { %1750 = sst [smem:[#allocation31_spill]] %s1722_s7 }
   0x9   :  { %1751 = sst [smem:[#allocation32_spill]] %s1723_s8 }
   0xa   :  { %29 = vsyncpa [#allocation3], 0 }
   0xb   :  { %30 = vsyncpa [#allocation6], 0 }
   0xc   :  { %31 = vsyncpa [#allocation9], 0 }
   0xd   :  { %32 = vsyncpa [#allocation12], 0 }
   0xe   :  { %33 = vsyncpa [#allocation15], 0  ;;  %s1752_s27 = sld [smem:[#allocation25_spill]] }
  0x14   :  { %s50_s28 = sshll.u32 %s1752_s27, 4  ;;  %s51_s28 = int_to_ptr.hbm [resolvable:$true] %s50_s28 }
  0x15   :  { %34 = vsyncpa [#allocation4], 0  ;;  %s1356_s6 = smov [#allocation5]   ;;  %s1753_s7 = sld [smem:[#allocation27_spill]] }
  0x16   :  { %s52_s2 = sshll.u32 %s1356_s6, 4  ;;  %s1357_s3 = smov 128   ;;  %s53_s2 = int_to_ptr.vmem [resolvable:$true] %s52_s2 }
  0x17   :  { %s1358_s25 = smov 8   ;;  %s1359_s8 = smov [#allocation8]  }
  0x18   :  { %58 = dma.hbm_to_vmem [thread:$0]  %s51_s28, 512, %s53_s2, [#allocation6], %s1357_s3, %s1357_s3, %s1358_s25  }
  0x19   :  { %s77_s4 = sshll.u32 %s1359_s8, 4  ;;  %s112_s26 = sshll.u32 %s1727_s12, 4  ;;  %s78_s4 = int_to_ptr.vmem [resolvable:$true] %s77_s4  ;;  %s113_s26 = int_to_ptr.hbm [resolvable:$true] %s112_s26 }
  0x1a   :  { %s142_s29 = sshll.u32 %s1731_s16, 4  ;;  %s1360_s0 = smov [#allocation11]   ;;  %s143_s29 = int_to_ptr.hbm [resolvable:$true] %s142_s29 }
  0x1b   :  { %s75_s30 = sshll.u32 %s1753_s7, 4  ;;  %s114_s7 = sshll.u32 %s1360_s0, 4  ;;  %s76_s30 = int_to_ptr.hbm [resolvable:$true] %s75_s30  ;;  %s115_s7 = int_to_ptr.vmem [resolvable:$true] %s114_s7 }
  0x1c   :  { %80 = dma.hbm_to_vmem [thread:$0]  %s76_s30, 128, %s78_s4, [#allocation9]  }
  0x1d   :  { %120 = dma.hbm_to_vmem [thread:$0]  %s113_s26, 1024, %s115_s7, [#allocation12], %s1357_s3, %s1357_s3, %s1358_s25  }
  0x1e   :  { %s1361_s28 = smov [#allocation14]   ;;  %s1754_s12 = sld [smem:[#allocation24_spill]] }
  0x1f   :  { %s144_s2 = sshll.u32 %s1361_s28, 4  ;;  %s1755_s4 = sld [smem:[#allocation26_spill]]  ;;  %s145_s2 = int_to_ptr.vmem [resolvable:$true] %s144_s2 }
  0x20   :  { %150 = dma.hbm_to_vmem [thread:$0]  %s143_s29, 1024, %s145_s2, [#allocation15], %s1357_s3, %s1357_s3, %s1358_s25  }
  0x21   :  { %s1362_s6 = smov [#allocation2]   ;;  %s1363_s26 = smov [#allocation7]  }
  0x22   :  { %s42_s0 = sshll.u32 %s1362_s6, 4  ;;  %s66_s7 = sshll.u32 %s1363_s26, 4  ;;  %s43_s0 = int_to_ptr.vmem [resolvable:$true] %s42_s0  ;;  %s67_s7 = int_to_ptr.vmem [resolvable:$true] %s66_s7 }
  0x23   :  { %s97_s1 = sshll.u32 %s1725_s10, 4  ;;  %s127_s2 = sshll.u32 %s1729_s14, 4  ;;  %s98_s1 = int_to_ptr.hbm [resolvable:$true] %s97_s1  ;;  %s128_s2 = int_to_ptr.hbm [resolvable:$true] %s127_s2 }
  0x24   :  { %s40_s5 = sshll.u32 %s1754_s12, 4  ;;  %s1364_s16 = smov [#allocation10]   ;;  %s41_s5 = int_to_ptr.hbm [resolvable:$true] %s40_s5 }
  0x25   :  { %s64_s27 = sshll.u32 %s1755_s4, 4  ;;  %s99_s30 = sshll.u32 %s1364_s16, 4  ;;  %s65_s27 = int_to_ptr.hbm [resolvable:$true] %s64_s27  ;;  %s100_s30 = int_to_ptr.vmem [resolvable:$true] %s99_s30 }
  0x26   :  { %45 = dma.hbm_to_vmem [thread:$0]  %s41_s5, 128, %s43_s0, [#allocation3]  }
  0x27   :  { %69 = dma.hbm_to_vmem [thread:$0]  %s65_s27, 16, %s67_s7, [#allocation6]  }
  0x28   :  { %105 = dma.hbm_to_vmem [thread:$0]  %s98_s1, 1024, %s100_s30, [#allocation9], %s1357_s3, %s1357_s3, %s1358_s25  }
  0x29   :  { %s1365_s5 = smov [#allocation13]   ;;  %s165_s10 = sshll.u32 %s1737_s22, 4  ;;  %s166_s10 = int_to_ptr.hbm [resolvable:$true] %s165_s10 }
  0x2a   :  { %s129_s4 = sshll.u32 %s1365_s5, 4  ;;  %s1366_s14 = smov [#allocation16]   ;;  %s130_s4 = int_to_ptr.vmem [resolvable:$true] %s129_s4 }
  0x2b   :  { %135 = dma.hbm_to_vmem [thread:$0]  %s128_s2, 1024, %s130_s4, [#allocation12], %s1357_s3, %s1357_s3, %s1358_s25  }
  0x2c   :  { %s167_s27 = sshll.u32 %s1366_s14, 4  ;;  %s168_s27 = int_to_ptr.vmem [resolvable:$true] %s167_s27 }
  0x2d   :  { %173 = dma.hbm_to_vmem [thread:$0]  %s166_s10, 512, %s168_s27, [#allocation15], %s1357_s3, %s1357_s3, %s1358_s25  }
  0x2e   :  { %1344 = dma.done.wait [#allocation3], 128  }
  0x2f   :  { %1345 = vsyncadd [#allocation3], 4294967168 }
  0x30   :  { %1346 = dma.done.wait [#allocation6], 528  }
  0x31   :  { %1347 = vsyncadd [#allocation6], 4294966768 }
  0x32   :  { %1348 = dma.done.wait [#allocation9], 1152  }
  0x33   :  { %1349 = vsyncadd [#allocation9], 4294966144 }
  0x34   :  { %1350 = dma.done.wait [#allocation12], 2048  }
  0x35   :  { %1351 = vsyncadd [#allocation12], 4294965248 }
  0x36   :  { %1352 = dma.done.wait [#allocation15], 1536  }
  0x37   :  { %1353 = vsyncadd [#allocation15], 4294965760  ;;  %v218_v0 = vld [vmem:[#allocation5 + $0x18] sm:$0xff]  ;;  %v217_v1 = vld [vmem:[#allocation5 + $0x10] sm:$0xff]  ;;  %s1756_s7 = sld [smem:[#allocation28_spill]]  ;;  %vm223_vm0 = vcmask 261120   ;;  %v370_v33 = vlaneseq }
  0x38   :  { %239 = vmatpush.msra.mxu2 %v218_v0  ;;  %v216_v2 = vld [vmem:[#allocation5 + $0x8] sm:$0xff]  ;;  %v215_v4 = vld [vmem:[#allocation5] sm:$0xff]  ;;  %s1757_s28 = sld [smem:[#allocation32_spill]]  ;;  %v214_v6 = vld [vmem:[#allocation2] sm:$0xff]  ;;  %vm342_vm1 = vcmask 130048   ;;  %s1367_s6 = smov 112  }
  0x39   :  { %s1758_s12 = sld [smem:[#allocation30_spill]]  ;;  %v1064_v17 = vld [vmem:[#allocation7] ss:$0 sm:$0xff]  ;;  %v247_v19 = vld [vmem:[#allocation8] sm:$0xff]  ;;  %v1067_v23 = vld [vmem:[%s1724_s9 + $0x1] ss:$0 sm:$0xff] }
  0x3a   :  { %240 = vmatpush.msra.mxu2 %v217_v1  ;;  %s1760_s4 = sld [smem:[#allocation29_spill]]  ;;  %v371_v34 = vshrl.u32 %v370_v33, 7  ;;  %v373_v35 = vand.u32 127, %v370_v33  ;;  %vm376_vm3 = vcmask 64512   ;;  %s1368_s9 = smov 16   ;;  %v552_v33 = vld [vmem:[#allocation10 + $0x38] sm:$0xff] }
  0x3c   :  { %241 = vmatpush.msra.mxu2 %v216_v2  ;;  %vm374_vm2 = vcmp.gt.s32.totalorder %v373_v35, %v371_v34  ;;  %v559_v34 = vld [vmem:[#allocation11 + $0x38] sm:$0xff] }
  0x3d   :  { %v1003_v3 = vld [vmem:[%s1756_s7 + $0x38] sm:$0xff]  ;;  %v1002_v8 = vld [vmem:[%s1756_s7 + $0x30] sm:$0xff]  ;;  %v1001_v11 = vld [vmem:[%s1756_s7 + $0x28] sm:$0xff] }
  0x3e   :  { %288 = vmatpush.msra.mxu1 %v1003_v3  ;;  %v1013_v5 = vld [vmem:[%s1757_s28 + $0x38] sm:$0xff]  ;;  %242 = vmatpush.msra.mxu2 %v215_v4  ;;  %v1012_v10 = vld [vmem:[%s1757_s28 + $0x30] sm:$0xff]  ;;  %v1011_v13 = vld [vmem:[%s1757_s28 + $0x28] sm:$0xff] }
  0x3f   :  { %334 = vmatpush.msra.mxu3 %v1013_v5  ;;  %v1008_v7 = vld [vmem:[%s1758_s12 + $0x38] sm:$0xff]  ;;  %999 = vmatmul.msk.f32.vlgmr.msra.gmra.mxu2 %vm223_vm0, %v214_v6  ;;  %v1007_v9 = vld [vmem:[%s1758_s12 + $0x30] sm:$0xff]  ;;  %v1006_v12 = vld [vmem:[%s1758_s12 + $0x28] sm:$0xff] }
  0x40   :  { %311 = vmatpush.msrb.mxu2 %v1008_v7  ;;  %289 = vmatpush.msra.mxu1 %v1002_v8  ;;  %v1000_v14 = vld [vmem:[%s1756_s7 + $0x20] sm:$0xff]  ;;  %v566_v35 = vld [vmem:[#allocation13 + $0x38] sm:$0xff] }
  0x41   :  { %335 = vmatpush.msra.mxu3 %v1012_v10  ;;  %v1005_v15 = vld [vmem:[%s1758_s12 + $0x20] sm:$0xff]  ;;  %s1759_s12 = sld [smem:[#allocation31_spill]] }
  0x42   :  { %312 = vmatpush.msrb.mxu2 %v1007_v9  ;;  %290 = vmatpush.msra.mxu1 %v1001_v11  ;;  %v1010_v16 = vld [vmem:[%s1757_s28 + $0x20] sm:$0xff] }
  0x43   :  { %336 = vmatpush.msra.mxu3 %v1011_v13  ;;  %v1065_v24 = vld [vmem:[%s1760_s4 + $0x1] ss:$0 sm:$0xff] }
  0x44   :  { %313 = vmatpush.msrb.mxu2 %v1006_v12  ;;  %291 = vmatpush.msra.mxu1 %v1000_v14 }
  0x45   :  { %337 = vmatpush.msra.mxu3 %v1010_v16 }
  0x46   :  { %314 = vmatpush.msrb.mxu2 %v1005_v15 }
  0x47   :  { %v1066_v22 = vld [vmem:[%s1759_s12 + $0x1] ss:$0 sm:$0xff] }
  0xc2   :  { %v244_v18 = vpop.f32.mrf.mxu2 }
  0xc3   :  { %v245_v20 = vadd.f32 %v1064_v17, %v244_v18 }
  0xc5   :  { %v1578_v21 = vadd.f32 %v247_v19, %v245_v20 }
  0xc7   :  { %1015 = vmatmul.msk.f32.vlgmr.msra.gmra.mxu1 %vm223_vm0, %v1578_v21  ;;  %1016 = vmatmul.msk.f32.vlgmr.msrb.gmra.mxu2 %vm223_vm0, %v1578_v21 }
  0xc8   :  { %1017 = vmatmul.msk.f32.vlgmr.msra.gmra.mxu3 %vm223_vm0, %v1578_v21 }
 0x144   :  { %v293_v26 = vpop.f32.mrf.mxu1 }
 0x145   :  { %v294_v30 = vadd.f32 %v1065_v24, %v293_v26 }
 0x14a   :  { %v316_v25 = vpop.f32.mrf.mxu2 }
 0x14b   :  { %v317_v27 = vadd.f32 %v1066_v22, %v316_v25  ;;  %v339_v28 = vpop.f32.mrf.mxu3  ;;  %v1369_v22 = vmov 32.0  }
 0x14c   :  { %v340_v29 = vadd.f32 %v1067_v23, %v339_v28 }
 0x14d   :  { %426 = vrot.lane.b32.xlu0 %v317_v27, %s1367_s6  ;;  %1018 = vmatpush.xpose.msk.msra.mxu0 %vm342_vm1, %v317_v27 }
 0x14e   :  { %419 = vmatpush.msrb.mxu1 %v340_v29 }
 0x150   :  { %1019 = vmatmul.msk.f32.vlgmr.msra.gmra.mxu0 %vm342_vm1, %v294_v30  ;;  %610 = vmatpush.msra.mxu1 %v559_v34 }
 0x151   :  { %587 = vmatpush.msrb.mxu0 %v552_v33 }
 0x155   :  { %424 = vrot.lane.b32.xlu0 %v294_v30, %s1367_s6 }
 0x1bf   :  { %v427_v31 = vpop.permute.xlu0 %426 }
 0x1c0   :  { %1021 = vmatpush.xpose.msk.msra.mxu2 %vm342_vm1, %v427_v31 }
 0x1c4   :  { %633 = vmatpush.msrb.mxu2 %v566_v35 }
 0x1c7   :  { %v425_v32 = vpop.permute.xlu0 %424 }
 0x1c8   :  { %1022 = vmatmul.msk.f32.vlgmr.msra.gmra.mxu2 %vm342_vm1, %v425_v32 }
 0x1cd   :  { %v366_v38 = vpop.f32.mrf.mxu0 }
 0x1ce   :  { %v369_v41 = vmul.f32 0.03125, %v366_v38  ;;  %v565_v38 = vld [vmem:[#allocation13 + $0x30] sm:$0xff] }
 0x1cf   :  { %634 = vmatpush.msrb.mxu2 %v565_v38 }
 0x1d0   :  { %v375_v42 = vsel %vm374_vm2, -inf, %v369_v41  ;;  %v564_v41 = vld [vmem:[#allocation13 + $0x28] sm:$0xff] }
 0x1d1   :  { %v377_v43 = vsel %vm376_vm3, %v375_v42, -inf  ;;  %635 = vmatpush.msrb.mxu2 %v564_v41 }
 0x24b   :  { %v449_v36 = vpop.f32.mrf.mxu2 }
 0x24c   :  { %v452_v37 = vmul.f32 0.03125, %v449_v36  ;;  %v551_v36 = vld [vmem:[#allocation10 + $0x30] sm:$0xff] }
 0x24d   :  { %588 = vmatpush.msrb.mxu0 %v551_v36 }
 0x24e   :  { %v453_v39 = vsel %vm374_vm2, -inf, %v452_v37  ;;  %v558_v37 = vld [vmem:[#allocation11 + $0x30] sm:$0xff] }
 0x24f   :  { %v454_v40 = vsel %vm376_vm3, %v453_v39, -inf  ;;  %611 = vmatpush.msra.mxu1 %v558_v37 }
 0x250   :  { %455 = vmax.xlane.f32.xlu1 %v454_v40  ;;  %v557_v40 = vld [vmem:[#allocation11 + $0x28] sm:$0xff] }
 0x251   :  { %612 = vmatpush.msra.mxu1 %v557_v40 }
 0x258   :  { %378 = vmax.xlane.f32.xlu1 %v377_v43  ;;  %v556_v43 = vld [vmem:[#allocation11 + $0x20] sm:$0xff] }
 0x259   :  { %613 = vmatpush.msra.mxu1 %v556_v43 }
 0x2c3   :  { %v456_v44 = vpop.xlane.xlu1 %455 }
 0x2c4   :  { %v457_v45 = vsub.f32 %v453_v39, %v456_v44  ;;  %v550_v39 = vld [vmem:[#allocation10 + $0x28] sm:$0xff]  ;;  %v563_v44 = vld [vmem:[#allocation13 + $0x20] sm:$0xff] }
 0x2c5   :  { %589 = vmatpush.msrb.mxu0 %v550_v39  ;;  %636 = vmatpush.msrb.mxu2 %v563_v44 }
 0x2c6   :  { %v458_v46 = vmul.f32 1.442695, %v457_v45 }
 0x2c8   :  { %1076 = vpow2.f32 %v458_v46 }
 0x2cb   :  { %v379_v47 = vpop.xlane.xlu1 %378 }
 0x2cc   :  { %v380_v48 = vsub.f32 %v375_v42, %v379_v47  ;;  %v549_v42 = vld [vmem:[#allocation10 + $0x20] sm:$0xff] }
 0x2cd   :  { %590 = vmatpush.msrb.mxu0 %v549_v42 }
 0x2ce   :  { %v1077_v49 = vpop.eup %1076  ;;  %v381_v50 = vmul.f32 1.442695, %v380_v48 }
 0x2cf   :  { %v460_v51 = vsel %vm376_vm3, %v1077_v49, 0.0 }
 0x2d0   :  { %1078 = vpow2.f32 %v381_v50  ;;  %461 = vadd.xlane.f32.xlu2 %v460_v51 }
 0x2d6   :  { %v1079_v52 = vpop.eup %1078 }
 0x2d7   :  { %v383_v53 = vsel %vm376_vm3, %v1079_v52, 0.0 }
 0x2d8   :  { %384 = vadd.xlane.f32.xlu0 %v383_v53 }
 0x2e8   :  { %479 = vrot.lane.b32.xlu2 %v340_v29, %s1367_s6 }
 0x343   :  { %v462_v54 = vpop.xlane.xlu2 %461 }
 0x344   :  { %1080 = vrcp.f32 %v462_v54  ;;  %v474_v60 = vand.u32 2147483648, %v462_v54  ;;  %v472_v62 = vand.u32 2147483647, %v462_v54  ;;  %vm468_vm5 = vweird.f32 %v462_v54 }
 0x346   :  { %v475_v1 = vor.u32 1.1754944e-38, %v474_v60  ;;  %vm473_vm7 = vcmp.eq.f32.partialorder %v472_v62, 8.507059e+37  ;;  %v1070_v60 = vld [vmem:[%s1726_s11 + $0x1] ss:$0 sm:$0xff] }
 0x34a   :  { %v1081_v55 = vpop.eup %1080 }
 0x34b   :  { %v464_v56 = vmul.f32 %v1081_v55, %v462_v54  ;;  %v480_v57 = vpop.permute.xlu2 %479  ;;  %v385_v58 = vpop.xlane.xlu0 %384  ;;  %vm469_vm4 = vweird.f32 %v1081_v55  ;;  %v1620_v54 = vld [vmem:[%s1735_s20] ss:$0 sm:$0xff] }
 0x34c   :  { %1082 = vrcp.f32 %v385_v58  ;;  %500 = vmatpush.msrb.mxu3 %v480_v57  ;;  %vm470_vm6 = vmor %vm468_vm5, %vm469_vm4  ;;  %v397_v7 = vand.u32 2147483648, %v385_v58  ;;  %v395_v9 = vand.u32 2147483647, %v385_v58  ;;  %vm391_vm9 = vweird.f32 %v385_v58  ;;  %v1625_v57 = vld [vmem:[%s1736_s21] ss:$0 sm:$0xff]  ;;  %s985_s21 = sshll.u32 %s1739_s24, 4  ;;  %s986_s21 = int_to_ptr.hbm [resolvable:$true] %s985_s21 }
 0x34d   :  { %v465_v59 = vsub.f32 1.0, %v464_v56  ;;  %1084 = vrcp.f32 %v1369_v22 }
 0x34e   :  { %v398_v11 = vor.u32 1.1754944e-38, %v397_v7  ;;  %vm396_vm11 = vcmp.eq.f32.partialorder %v395_v9, 8.507059e+37 }
 0x34f   :  { %v466_v61 = vmul.f32 %v1081_v55, %v465_v59 }
 0x351   :  { %v467_v63 = vadd.f32 %v1081_v55, %v466_v61  ;;  %v1071_v61 = vld [vmem:[%s1728_s13 + $0x1] ss:$0 sm:$0xff] }
 0x352   :  { %v1083_v0 = vpop.eup %1082 }
 0x353   :  { %v387_v2 = vmul.f32 %v1083_v0, %v385_v58  ;;  %v471_v3 = vsel %vm470_vm6, %v1081_v55, %v467_v63  ;;  %vm392_vm8 = vweird.f32 %v1083_v0  ;;  %v1085_v23 = vpop.eup %1084 }
 0x354   :  { %v476_v4 = vsel %vm473_vm7, %v475_v1, %v471_v3  ;;  %vm393_vm10 = vmor %vm391_vm9, %vm392_vm8  ;;  %v515_v24 = vmul.f32 32.0, %v1085_v23  ;;  %vm519_vm12 = vweird.f32 %v1085_v23 }
 0x355   :  { %v388_v5 = vsub.f32 1.0, %v387_v2  ;;  %v477_v6 = vmul.f32 %v1077_v49, %v476_v4  ;;  %v1072_v2 = vld [vmem:[%s1730_s15 + $0x1] ss:$0 sm:$0xff] }
 0x356   :  { %v516_v25 = vsub.f32 1.0, %v515_v24 }
 0x357   :  { %v389_v8 = vmul.f32 %v1083_v0, %v388_v5  ;;  %1023 = vmatmul.msk.f32.vlgmr.msrb.gmra.mxu3 %vm376_vm3, %v477_v6 }
 0x358   :  { %v517_v26 = vmul.f32 %v1085_v23, %v516_v25 }
 0x359   :  { %v390_v10 = vadd.f32 %v1083_v0, %v389_v8 }
 0x35a   :  { %v518_v27 = vadd.f32 %v1085_v23, %v517_v26 }
 0x35b   :  { %v394_v12 = vsel %vm393_vm10, %v1083_v0, %v390_v10 }
 0x35c   :  { %v399_v13 = vsel %vm396_vm11, %v398_v11, %v394_v12  ;;  %v1612_v28 = vsel %vm519_vm12, %v1085_v23, %v518_v27  ;;  %vm873_vm12 = vcmask 523264  }
 0x35d   :  { %v400_v14 = vmul.f32 %v1079_v52, %v399_v13 }
 0x35f   :  { %1020 = vmatmul.msk.f32.vlgmr.msrb.gmra.mxu1 %vm376_vm3, %v400_v14 }
 0x3da   :  { %v502_v15 = vpop.f32.mrf.mxu3 }
 0x3db   :  { %506 = vrot.lane.b32.xlu1 %v502_v15, %s1368_s9 }
 0x3dc   :  { %v421_v16 = vpop.f32.mrf.mxu1 }
 0x44d   :  { %v507_v17 = vpop.permute.xlu1 %506 }
 0x44e   :  { %v509_v18 = vsel %vm342_vm1, %v421_v16, %v507_v17 }
 0x44f   :  { %v510_v19 = vadd.f32 %v509_v18, %v1578_v21 }
 0x451   :  { %v511_v20 = vsel %vm223_vm0, %v510_v19, 0.0 }
 0x452   :  { %512 = vadd.xlane.f32.xlu2 %v511_v20 }
 0x4c5   :  { %v513_v29 = vpop.xlane.xlu2 %512 }
 0x4c6   :  { %v521_v30 = vmul.f32 %v1612_v28, %v513_v29 }
 0x4c8   :  { %v522_v31 = vsub.f32 %v510_v19, %v521_v30 }
 0x4ca   :  { %v523_v32 = vmul.f32 %v522_v31, %v522_v31 }
 0x4cc   :  { %v524_v21 = vsel %vm223_vm0, %v523_v32, 0.0 }
 0x4cd   :  { %525 = vadd.xlane.f32.xlu1 %v524_v21 }
 0x540   :  { %v526_v45 = vpop.xlane.xlu1 %525 }
 0x541   :  { %v527_v46 = vmul.f32 %v526_v45, %v1612_v28 }
 0x543   :  { %v528_v47 = vadd.f32 1e-05, %v527_v46 }
 0x545   :  { %1086 = vrsqrt.f32 %v528_v47  ;;  %vm535_vm14 = vweird.f32 %v528_v47 }
 0x54b   :  { %v1087_v48 = vpop.eup %1086 }
 0x54c   :  { %v530_v49 = vmul.f32 %v1087_v48, %v528_v47  ;;  %vm536_vm13 = vweird.f32 %v1087_v48 }
 0x54d   :  { %vm537_vm15 = vmor %vm535_vm14, %vm536_vm13 }
 0x54e   :  { %v531_v50 = vmul.f32 %v1087_v48, %v530_v49 }
 0x550   :  { %v532_v51 = vmul.f32 0.5, %v531_v50 }
 0x552   :  { %v533_v52 = vsub.f32 1.5, %v532_v51 }
 0x554   :  { %v534_v53 = vmul.f32 %v1087_v48, %v533_v52 }
 0x556   :  { %v538_v55 = vsel %vm537_vm15, %v1087_v48, %v534_v53 }
 0x557   :  { %v539_v56 = vmul.f32 %v538_v55, %v522_v31 }
 0x559   :  { %v543_v58 = vmul.f32 %v1620_v54, %v539_v56 }
 0x55b   :  { %v1629_v59 = vadd.f32 %v1625_v57, %v543_v58 }
 0x55d   :  { %1027 = vmatmul.msk.f32.vlgmr.msrb.gmra.mxu0 %vm223_vm0, %v1629_v59  ;;  %1028 = vmatmul.msk.f32.vlgmr.msra.gmra.mxu1 %vm223_vm0, %v1629_v59 }
 0x55e   :  { %1029 = vmatmul.msk.f32.vlgmr.msrb.gmra.mxu2 %vm223_vm0, %v1629_v59 }
 0x5da   :  { %v592_v62 = vpop.f32.mrf.mxu0  ;;  %v615_v63 = vpop.f32.mrf.mxu1 }
 0x5db   :  { %v593_v0 = vadd.f32 %v1070_v60, %v592_v62  ;;  %v616_v1 = vadd.f32 %v1071_v61, %v615_v63  ;;  %v829_v63 = vld [vmem:[#allocation14 + $0x38] sm:$0xff] }
 0x5dd   :  { %717 = vrot.lane.b32.xlu0 %v616_v1, %s1367_s6  ;;  %1030 = vmatpush.xpose.msk.msra.mxu3 %vm342_vm1, %v616_v1  ;;  %v827_v1 = vld [vmem:[#allocation14 + $0x28] sm:$0xff] }
 0x5de   :  { %715 = vrot.lane.b32.xlu2 %v593_v0, %s1367_s6 }
 0x5e0   :  { %1031 = vmatmul.msk.f32.vlgmr.msra.gmra.mxu3 %vm342_vm1, %v593_v0  ;;  %v828_v0 = vld [vmem:[#allocation14 + $0x30] sm:$0xff] }
 0x5e1   :  { %v638_v3 = vpop.f32.mrf.mxu2  ;;  %850 = vmatpush.msrb.mxu3 %v829_v63 }
 0x5e2   :  { %v639_v4 = vadd.f32 %v1072_v2, %v638_v3  ;;  %v826_v2 = vld [vmem:[#allocation14 + $0x20] sm:$0xff] }
 0x5e3   :  { %851 = vmatpush.msrb.mxu3 %v828_v0  ;;  %v1044_v3 = vld [vmem:[%s1733_s18 + $0x70] sm:$0xff] }
 0x5e4   :  { %710 = vmatpush.msra.mxu0 %v639_v4 }
 0x5e5   :  { %852 = vmatpush.msrb.mxu3 %v827_v1 }
 0x5e6   :  { %769 = vrot.lane.b32.xlu2 %v639_v4, %s1367_s6  ;;  %v1043_v4 = vld [vmem:[%s1733_s18 + $0x68] sm:$0xff] }
 0x5e7   :  { %853 = vmatpush.msrb.mxu3 %v826_v2 }
 0x638   :  { %v716_v5 = vpop.permute.xlu2 %715 }
 0x640   :  { %v770_v6 = vpop.permute.xlu2 %769 }
 0x641   :  { %790 = vmatpush.msra.mxu2 %v770_v6 }
 0x64f   :  { %v718_v7 = vpop.permute.xlu0 %717 }
 0x650   :  { %1033 = vmatpush.xpose.msk.msrb.mxu1 %vm342_vm1, %v718_v7  ;;  %v1042_v7 = vld [vmem:[%s1733_s18 + $0x60] sm:$0xff] }
 0x653   :  { %1034 = vmatmul.msk.f32.vlgmr.msrb.gmra.mxu1 %vm342_vm1, %v716_v5 }
 0x663   :  { %v664_v8 = vpop.f32.mrf.mxu3 }
 0x664   :  { %v667_v9 = vmul.f32 0.03125, %v664_v8 }
 0x666   :  { %v668_v10 = vsel %vm376_vm3, %v667_v9, -inf }
 0x667   :  { %669 = vmax.xlane.f32.xlu1 %v668_v10 }
 0x6d0   :  { %v740_v11 = vpop.f32.mrf.mxu1 }
 0x6d1   :  { %v743_v12 = vmul.f32 0.03125, %v740_v11 }
 0x6d3   :  { %v744_v13 = vsel %vm376_vm3, %v743_v12, -inf }
 0x6d4   :  { %745 = vmax.xlane.f32.xlu0 %v744_v13 }
 0x6da   :  { %v670_v14 = vpop.xlane.xlu1 %669 }
 0x6db   :  { %v671_v17 = vsub.f32 %v667_v9, %v670_v14  ;;  %v1041_v9 = vld [vmem:[%s1733_s18 + $0x58] sm:$0xff] }
 0x6dd   :  { %v672_v19 = vmul.f32 1.442695, %v671_v17 }
 0x747   :  { %v746_v15 = vpop.xlane.xlu0 %745 }
 0x748   :  { %v747_v16 = vsub.f32 %v743_v12, %v746_v15 }
 0x74a   :  { %v748_v18 = vmul.f32 1.442695, %v747_v16 }
 0x74c   :  { %1088 = vpow2.f32 %v748_v18 }
 0x74d   :  { %1090 = vpow2.f32 %v672_v19 }
 0x752   :  { %v1089_v20 = vpop.eup %1088 }
 0x753   :  { %v750_v22 = vsel %vm376_vm3, %v1089_v20, 0.0  ;;  %v1091_v23 = vpop.eup %1090 }
 0x754   :  { %751 = vadd.xlane.f32.xlu1 %v750_v22  ;;  %v674_v24 = vsel %vm376_vm3, %v1091_v23, 0.0  ;;  %v1039_v22 = vld [vmem:[%s1733_s18 + $0x48] sm:$0xff] }
 0x75c   :  { %675 = vadd.xlane.f32.xlu1 %v674_v24  ;;  %v1073_v24 = vld [vmem:[%s1732_s17 + $0x1] ss:$0 sm:$0xff] }
 0x7c7   :  { %v752_v25 = vpop.xlane.xlu1 %751 }
 0x7c8   :  { %1092 = vrcp.f32 %v752_v25  ;;  %v764_v31 = vand.u32 2147483648, %v752_v25  ;;  %v762_v21 = vand.u32 2147483647, %v752_v25  ;;  %vm758_vm4 = vweird.f32 %v752_v25 }
 0x7ca   :  { %v765_v35 = vor.u32 1.1754944e-38, %v764_v31  ;;  %vm763_vm6 = vcmp.eq.f32.partialorder %v762_v21, 8.507059e+37 }
 0x7ce   :  { %v1093_v26 = vpop.eup %1092 }
 0x7cf   :  { %v754_v27 = vmul.f32 %v1093_v26, %v752_v25  ;;  %v676_v29 = vpop.xlane.xlu1 %675  ;;  %vm759_vm2 = vweird.f32 %v1093_v26 }
 0x7d0   :  { %1094 = vrcp.f32 %v676_v29  ;;  %vm760_vm5 = vmor %vm758_vm4, %vm759_vm2  ;;  %v688_v41 = vand.u32 2147483648, %v676_v29  ;;  %v686_v43 = vand.u32 2147483647, %v676_v29  ;;  %vm682_vm8 = vweird.f32 %v676_v29 }
 0x7d1   :  { %v755_v30 = vsub.f32 1.0, %v754_v27 }
 0x7d2   :  { %v689_v45 = vor.u32 1.1754944e-38, %v688_v41  ;;  %vm687_vm10 = vcmp.eq.f32.partialorder %v686_v43, 8.507059e+37  ;;  %v922_v41 = vld [vmem:[#allocation16] sm:$0xff] }
 0x7d3   :  { %v756_v32 = vmul.f32 %v1093_v26, %v755_v30 }
 0x7d5   :  { %v757_v33 = vadd.f32 %v1093_v26, %v756_v32 }
 0x7d6   :  { %v1095_v34 = vpop.eup %1094 }
 0x7d7   :  { %v761_v36 = vsel %vm760_vm5, %v1093_v26, %v757_v33  ;;  %v678_v37 = vmul.f32 %v1095_v34, %v676_v29  ;;  %vm683_vm7 = vweird.f32 %v1095_v34  ;;  %v1074_v29 = vld [vmem:[%s1734_s19 + $0x1] ss:$0 sm:$0xff]  ;;  %s1370_s19 = smov [#allocation17]  }
 0x7d8   :  { %v766_v38 = vsel %vm763_vm6, %v765_v35, %v761_v36  ;;  %vm684_vm9 = vmor %vm682_vm8, %vm683_vm7 }
 0x7d9   :  { %v679_v39 = vsub.f32 1.0, %v678_v37  ;;  %v767_v40 = vmul.f32 %v1089_v20, %v766_v38  ;;  %v1040_v20 = vld [vmem:[%s1733_s18 + $0x50] sm:$0xff] }
 0x7da   :  { %v925_v38 = vld [vmem:[#allocation16 + $0x18] sm:$0xff] }
 0x7db   :  { %v680_v42 = vmul.f32 %v1095_v34, %v679_v39  ;;  %1035 = vmatmul.msk.f32.vlgmr.msra.gmra.mxu2 %vm376_vm3, %v767_v40  ;;  %945 = vmatpush.msra.mxu1 %v925_v38  ;;  %v924_v39 = vld [vmem:[#allocation16 + $0x10] sm:$0xff]  ;;  %v923_v40 = vld [vmem:[#allocation16 + $0x8] sm:$0xff] }
 0x7dd   :  { %v681_v44 = vadd.f32 %v1095_v34, %v680_v42  ;;  %946 = vmatpush.msra.mxu1 %v924_v39 }
 0x7df   :  { %v685_v46 = vsel %vm684_vm9, %v1095_v34, %v681_v44  ;;  %947 = vmatpush.msra.mxu1 %v923_v40 }
 0x7e0   :  { %v690_v47 = vsel %vm687_vm10, %v689_v45, %v685_v46 }
 0x7e1   :  { %v691_v48 = vmul.f32 %v1091_v23, %v690_v47  ;;  %v1038_v23 = vld [vmem:[%s1733_s18 + $0x40] sm:$0xff]  ;;  %948 = vmatpush.msra.mxu1 %v922_v41 }
 0x7e3   :  { %1032 = vmatmul.msk.f32.vlgmr.msra.gmra.mxu0 %vm376_vm3, %v691_v48 }
 0x85e   :  { %v792_v49 = vpop.f32.mrf.mxu2 }
 0x85f   :  { %796 = vrot.lane.b32.xlu2 %v792_v49, %s1368_s9 }
 0x860   :  { %v712_v50 = vpop.f32.mrf.mxu0 }
 0x8b9   :  { %v797_v51 = vpop.permute.xlu2 %796 }
 0x8ba   :  { %v799_v52 = vsel %vm342_vm1, %v712_v50, %v797_v51 }
 0x8bb   :  { %v800_v53 = vadd.f32 %v799_v52, %v1629_v59  ;;  %v1045_v59 = vld [vmem:[%s1733_s18 + $0x78] sm:$0xff] }
 0x8bc   :  { %885 = vmatpush.msrb.mxu0 %v1045_v59 }
 0x8bd   :  { %v801_v55 = vsel %vm223_vm0, %v800_v53, 0.0 }
 0x8be   :  { %802 = vadd.xlane.f32.xlu1 %v801_v55  ;;  %886 = vmatpush.msrb.mxu0 %v1044_v3 }
 0x8c0   :  { %887 = vmatpush.msrb.mxu0 %v1043_v4 }
 0x8c2   :  { %888 = vmatpush.msrb.mxu0 %v1042_v7 }
 0x8c4   :  { %889 = vmatpush.msrb.mxu0 %v1041_v9 }
 0x8c6   :  { %890 = vmatpush.msrb.mxu0 %v1040_v20 }
 0x8c8   :  { %891 = vmatpush.msrb.mxu0 %v1039_v22 }
 0x8ca   :  { %892 = vmatpush.msrb.mxu0 %v1038_v23 }
 0x931   :  { %v803_v56 = vpop.xlane.xlu1 %802 }
 0x932   :  { %v804_v58 = vmul.f32 %v803_v56, %v1612_v28 }
 0x934   :  { %v805_v60 = vsub.f32 %v800_v53, %v804_v58 }
 0x936   :  { %v806_v61 = vmul.f32 %v805_v60, %v805_v60 }
 0x938   :  { %v807_v62 = vsel %vm223_vm0, %v806_v61, 0.0 }
 0x939   :  { %808 = vadd.xlane.f32.xlu2 %v807_v62 }
 0x9ac   :  { %v809_v5 = vpop.xlane.xlu2 %808 }
 0x9ad   :  { %v810_v6 = vmul.f32 %v809_v5, %v1612_v28 }
 0x9af   :  { %v811_v8 = vadd.f32 1e-05, %v810_v6 }
 0x9b1   :  { %1096 = vrsqrt.f32 %v811_v8  ;;  %vm818_vm3 = vweird.f32 %v811_v8 }
 0x9b7   :  { %v1097_v10 = vpop.eup %1096 }
 0x9b8   :  { %v813_v11 = vmul.f32 %v1097_v10, %v811_v8  ;;  %vm819_vm1 = vweird.f32 %v1097_v10 }
 0x9b9   :  { %vm820_vm11 = vmor %vm818_vm3, %vm819_vm1 }
 0x9ba   :  { %v814_v12 = vmul.f32 %v1097_v10, %v813_v11 }
 0x9bc   :  { %v815_v13 = vmul.f32 0.5, %v814_v12 }
 0x9be   :  { %v816_v14 = vsub.f32 1.5, %v815_v13 }
 0x9c0   :  { %v817_v15 = vmul.f32 %v1097_v10, %v816_v14 }
 0x9c2   :  { %v821_v16 = vsel %vm820_vm11, %v1097_v10, %v817_v15 }
 0x9c3   :  { %v822_v17 = vmul.f32 %v821_v16, %v805_v60 }
 0x9c5   :  { %v823_v18 = vmul.f32 %v1620_v54, %v822_v17 }
 0x9c7   :  { %v824_v19 = vadd.f32 %v1625_v57, %v823_v18 }
 0x9c9   :  { %1037 = vmatmul.msk.f32.vlgmr.msrb.gmra.mxu3 %vm223_vm0, %v824_v19 }
 0xa4c   :  { %v855_v25 = vpop.f32.mrf.mxu3 }
 0xa4d   :  { %v856_v26 = vadd.f32 %v1073_v24, %v855_v25 }
 0xa4f   :  { %v858_v27 = vmax.f32 %v856_v26, 0.0 }
 0xa51   :  { %1047 = vmatmul.msk.f32.vlgmr.msrb.gmra.mxu0 %vm873_vm12, %v858_v27 }
 0xace   :  { %v894_v30 = vpop.f32.mrf.mxu0 }
 0xacf   :  { %v895_v31 = vadd.f32 %v1074_v29, %v894_v30 }
 0xad1   :  { %v897_v32 = vadd.f32 %v895_v31, %v824_v19 }
 0xad3   :  { %v898_v21 = vsel %vm223_vm0, %v897_v32, 0.0 }
 0xad4   :  { %899 = vadd.xlane.f32.xlu1 %v898_v21 }
 0xb47   :  { %v900_v33 = vpop.xlane.xlu1 %899 }
 0xb48   :  { %v901_v34 = vmul.f32 %v900_v33, %v1612_v28 }
 0xb4a   :  { %v902_v35 = vsub.f32 %v897_v32, %v901_v34 }
 0xb4c   :  { %v903_v36 = vmul.f32 %v902_v35, %v902_v35 }
 0xb4e   :  { %v904_v37 = vsel %vm223_vm0, %v903_v36, 0.0 }
 0xb4f   :  { %905 = vadd.xlane.f32.xlu0 %v904_v37 }
 0xbc2   :  { %v906_v42 = vpop.xlane.xlu0 %905 }
 0xbc3   :  { %v907_v43 = vmul.f32 %v906_v42, %v1612_v28  ;;  %v1075_v28 = vld [vmem:[%s1738_s23] ss:$0 sm:$0xff]  ;;  %s983_s23 = sshll.u32 %s1370_s19, 4  ;;  %s984_s23 = int_to_ptr.vmem [resolvable:$true] %s983_s23 }
 0xbc5   :  { %v908_v44 = vadd.f32 1e-05, %v907_v43 }
 0xbc7   :  { %1098 = vrsqrt.f32 %v908_v44  ;;  %vm915_vm14 = vweird.f32 %v908_v44 }
 0xbcd   :  { %v1099_v45 = vpop.eup %1098 }
 0xbce   :  { %v910_v46 = vmul.f32 %v1099_v45, %v908_v44  ;;  %vm916_vm13 = vweird.f32 %v1099_v45 }
 0xbcf   :  { %vm917_vm15 = vmor %vm915_vm14, %vm916_vm13 }
 0xbd0   :  { %v911_v47 = vmul.f32 %v1099_v45, %v910_v46 }
 0xbd2   :  { %v912_v48 = vmul.f32 0.5, %v911_v47 }
 0xbd4   :  { %v913_v49 = vsub.f32 1.5, %v912_v48 }
 0xbd6   :  { %v914_v50 = vmul.f32 %v1099_v45, %v913_v49 }
 0xbd8   :  { %v918_v51 = vsel %vm917_vm15, %v1099_v45, %v914_v50 }
 0xbd9   :  { %v919_v52 = vmul.f32 %v918_v51, %v902_v35 }
 0xbdb   :  { %v920_v53 = vmul.f32 %v1620_v54, %v919_v52 }
 0xbdd   :  { %v921_v55 = vadd.f32 %v1625_v57, %v920_v53 }
 0xbdf   :  { %1048 = vmatmul.msk.f32.vlgmr.msra.gmra.mxu1 %vm223_vm0, %v921_v55 }
 0xc5c   :  { %v950_v56 = vpop.f32.mrf.mxu1 }
 0xc5d   :  { %v951_v58 = vadd.f32 %v1075_v28, %v950_v56 }
 0xc5f   :  { %v953_v60 = vsel %vm223_vm0, %v951_v58, -inf }
 0xc60   :  { %954 = vmax.xlane.f32.xlu1 %v953_v60 }
 0xcd3   :  { %v955_v61 = vpop.xlane.xlu1 %954 }
 0xcd4   :  { %v956_v62 = vsub.f32 %v951_v58, %v955_v61 }
 0xcd6   :  { %v957_v63 = vmul.f32 1.442695, %v956_v62 }
 0xcd8   :  { %1100 = vpow2.f32 %v957_v63 }
 0xcde   :  { %v1101_v0 = vpop.eup %1100 }
 0xcdf   :  { %v959_v54 = vsel %vm223_vm0, %v1101_v0, 0.0 }
 0xce0   :  { %960 = vadd.xlane.f32.xlu0 %v959_v54 }
 0xd53   :  { %v961_v57 = vpop.xlane.xlu0 %960 }
 0xd54   :  { %1102 = vrcp.f32 %v961_v57  ;;  %v973_v3 = vand.u32 2147483648, %v961_v57  ;;  %v971_v5 = vand.u32 2147483647, %v961_v57  ;;  %vm967_vm4 = vweird.f32 %v961_v57 }
 0xd56   :  { %v974_v7 = vor.u32 1.1754944e-38, %v973_v3  ;;  %vm972_vm6 = vcmp.eq.f32.partialorder %v971_v5, 8.507059e+37 }
 0xd5a   :  { %v1103_v1 = vpop.eup %1102 }
 0xd5b   :  { %v963_v2 = vmul.f32 %v1103_v1, %v961_v57  ;;  %vm968_vm2 = vweird.f32 %v1103_v1 }
 0xd5c   :  { %vm969_vm5 = vmor %vm967_vm4, %vm968_vm2 }
 0xd5d   :  { %v964_v59 = vsub.f32 1.0, %v963_v2 }
 0xd5f   :  { %v965_v4 = vmul.f32 %v1103_v1, %v964_v59 }
 0xd61   :  { %v966_v6 = vadd.f32 %v1103_v1, %v965_v4 }
 0xd63   :  { %v970_v8 = vsel %vm969_vm5, %v1103_v1, %v966_v6 }
 0xd64   :  { %v975_v9 = vsel %vm972_vm6, %v974_v7, %v970_v8 }
 0xd65   :  { %v976_v10 = vmul.f32 %v1101_v0, %v975_v9 }
 0xd67   :  { %977 = vst.msk [vmem:[#allocation17] sm:$0xff] %vm223_vm0, %v976_v10 }
 0xd68   :  { %988 = dma.vmem_to_hbm [thread:$0]  %s984_s23, 128, %s986_s21, [#allocation4]  }
 0xd69   :  { %1354 = dma.done.wait [#allocation4], 128  }
 0xd6a   :  { %1355 = vsyncadd [#allocation4], 4294967168 }
 0xd6b   :  { %993 = vsyncpa [#allocation3], 1 }
 0xd6c   :  { %994 = vsyncpa [#allocation6], 1 }
 0xd6d   :  { %995 = vsyncpa [#allocation9], 1 }
 0xd6e   :  { %996 = vsyncpa [#allocation12], 1 }
 0xd6f   :  { %997 = vsyncpa [#allocation15], 1 }
 0xd70   :  { %998 = vsyncpa [#allocation4], 1 }

</bundles_post_ra>
